<compile_context>
chip_gen: v5e
topology: v5e:2x2
jax: 0.10.0
libtpu: 0.0.40
codegen_flags: <defaults>
</compile_context>

<pallas_src>
import jax
import jax.numpy as jnp
from jax import lax
from jax.experimental import pallas as pl
from jax.experimental.pallas import tpu as pltpu

_EPS = 1e-5        # torch.nn.BatchNorm1d default eps
_HIDDEN = 128      # LSTM hidden size / head width (fixed by the module)


def _bn_train(v, gamma, beta):
    """BatchNorm1d, training mode: two-pass centered batch stats (biased var)."""
    mean = jnp.mean(v, axis=0, keepdims=True)
    cen = v - mean
    var = jnp.mean(cen * cen, axis=0, keepdims=True)
    return cen * (gamma * lax.rsqrt(var + _EPS)) + beta


# --------------------------------------------------------------------------
# Stage 1: LSTM recurrence -> last hidden state h_T
# --------------------------------------------------------------------------
def _lstm_kernel(x_ref, wih_ref, whh_ref, b_ref, h_out_ref, xw_ref):
    SB, _ = x_ref.shape
    B, H = h_out_ref.shape
    S = SB // B

    # Hoisted input projection with the gate bias folded in: one matmul over
    # all timesteps instead of S tiny K=D matmuls + bias adds on the serial
    # recurrence path.
    xw_ref[...] = (
        jnp.dot(x_ref[...].astype(wih_ref.dtype), wih_ref[...],
                preferred_element_type=jnp.float32)
        + b_ref[...])                                           # (S*B, 4H)

    def step(t, carry):
        h, c = carry
        row = pl.multiple_of(t * B, B)                          # aligned sublane slice
        g = (jnp.dot(h.astype(whh_ref.dtype), whh_ref[...],
                     preferred_element_type=jnp.float32)
             + xw_ref[pl.ds(row, B), :])                        # (B, 4H)
        i = jax.nn.sigmoid(g[:, 0:H])
        f = jax.nn.sigmoid(g[:, H:2 * H])
        gg = jnp.tanh(g[:, 2 * H:3 * H])
        o = jax.nn.sigmoid(g[:, 3 * H:4 * H])
        c_new = f * c + i * gg
        h_new = o * jnp.tanh(c_new)
        return (h_new, c_new)

    h0 = jnp.zeros((B, H), jnp.float32)
    c0 = jnp.zeros((B, H), jnp.float32)
    unroll = True if S <= 16 else 8          # bounded unroll for long sequences
    h_last, _ = lax.fori_loop(0, S, step, (h0, c0), unroll=unroll)
    h_out_ref[...] = h_last


# --------------------------------------------------------------------------
# Stage 2: one grid step per output head (core-parallelizable on v7x)
# --------------------------------------------------------------------------
def _heads_kernel(feat_ref, w1s_ref, w2s_ref, bnp_ref, bn1l_ref, wlast_ref,
                  scal_ref, out_ref):
    head = pl.program_id(0)
    wdt = w1s_ref.dtype
    z = feat_ref[...]                                            # (B, 128) f32

    # three [VectorResBlock(128,128), ReLU]
    for j in range(3):                                           # static unroll
        bnp = bnp_ref[j]                                         # (4,128): g1,b1,g2,b2
        o = jnp.maximum(_bn_train(z, bnp[0:1], bnp[1:2]), 0.0)   # bn1 + relu
        o = jnp.dot(o.astype(wdt), w1s_ref[j],
                    preferred_element_type=jnp.float32)          # fc1
        o = jnp.maximum(_bn_train(o, bnp[2:3], bnp[3:4]), 0.0)   # bn2 + relu
        o = jnp.dot(o.astype(wdt), w2s_ref[j],
                    preferred_element_type=jnp.float32)          # fc2
        z = jnp.maximum(z + o, 0.0)           # residual add + Sequential ReLU

    # last VectorResBlock(128 -> 1): N=1 matmuls as VPU mul + lane reductions
    bn1l = bn1l_ref[...]                                         # (2,128): g1, b1
    a = jnp.maximum(_bn_train(z, bn1l[0:1], bn1l[1:2]), 0.0)     # bn1 + relu
    w1row = wlast_ref[0:1, :].astype(jnp.float32)                # fc1 weight row
    wdrow = wlast_ref[1:2, :].astype(jnp.float32)                # downsample weight row
    f1 = jnp.sum(a * w1row, axis=-1, keepdims=True)              # (B, 1)  fc1
    d = jnp.sum(z * wdrow, axis=-1, keepdims=True)               # (B, 1)  downsample Linear

    g2 = scal_ref[head, 0]
    b2 = scal_ref[head, 1]
    w2 = scal_ref[head, 2]
    gd = scal_ref[head, 3]
    bd = scal_ref[head, 4]
    f2 = jnp.maximum(_bn_train(f1, g2, b2), 0.0) * w2            # bn2 + relu + fc2 (1x1)
    ident = _bn_train(d, gd, bd)                                 # downsample BN
    out_ref[...] = (f2 + ident).astype(out_ref.dtype)            # (B, 1), no final relu


def _pack_head_params(heads, weight_dtype=jnp.float32):
    """Stack per-head params into a few dense arrays (pure layout plumbing)."""
    w1s, w2s, bnp, bn1l, wlast, scal = [], [], [], [], [], []
    for hd in heads:
        w1s.append(jnp.stack([b["w1"].T for b in hd["blocks128"]]))           # (3,H,H)
        w2s.append(jnp.stack([b["w2"].T for b in hd["blocks128"]]))           # (3,H,H)
        bnp.append(jnp.stack([jnp.stack([b["g1"], b["b1"], b["g2"], b["b2"]])
                              for b in hd["blocks128"]]))                     # (3,4,H)
        lb = hd["last"]
        bn1l.append(jnp.stack([lb["g1"], lb["b1"]]))                          # (2,H)
        wlast.append(jnp.stack([lb["w1"][0], lb["wd"][0]]))                   # (2,H)
        scal.append(jnp.stack([lb["g2"][0], lb["b2"][0], lb["w2"][0, 0],
                               lb["gd"][0], lb["bd"][0]]))                    # (5,)
    return (jnp.stack(w1s).astype(weight_dtype),
            jnp.stack(w2s).astype(weight_dtype),
            jnp.stack(bnp), jnp.stack(bn1l),
            jnp.stack(wlast), jnp.stack(scal))


def best_gain_lstm_forward(x, params, *, use_bf16_weights=False):
    """x: (batch, seq, feature_input_dim) f32 -> (batch, num_bs) f32."""
    B, S, D = x.shape
    H = _HIDDEN
    num_bs = len(params["heads"])
    wdt = jnp.bfloat16 if use_bf16_weights else jnp.float32

    # ---- stage 1: LSTM (wrapper only reshapes/transposes, no compute) ----
    x2d = jnp.transpose(x, (1, 0, 2)).reshape(S * B, D)          # time-major, flattened
    wih_t = params["lstm"]["w_ih"].T.astype(wdt)                 # (D, 4H)
    whh_t = params["lstm"]["w_hh"].T.astype(wdt)                 # (H, 4H)
    bias = (params["lstm"]["b_ih"] + params["lstm"]["b_hh"]).reshape(1, 4 * H)

    feat = pl.pallas_call(
        _lstm_kernel,
        out_shape=jax.ShapeDtypeStruct((B, H), jnp.float32),
        scratch_shapes=[pltpu.VMEM((S * B, 4 * H), jnp.float32)],   # hoisted x-projection
        compiler_params=pltpu.CompilerParams(vmem_limit_bytes=64 * 1024 * 1024),
    )(x2d, wih_t, whh_t, bias)

    # ---- stage 2: output heads (grid over heads, core-parallel on v7x) ----
    w1s, w2s, bnp, bn1l, wlast, scal = _pack_head_params(params["heads"], wdt)

    in_specs = [
        pl.BlockSpec((B, H), lambda h: (0, 0)),                   # h_T (same block for all heads)
        pl.BlockSpec((None, 3, H, H), lambda h: (h, 0, 0, 0)),    # per-head fc1^T x3
        pl.BlockSpec((None, 3, H, H), lambda h: (h, 0, 0, 0)),    # per-head fc2^T x3
        pl.BlockSpec((None, 3, 4, H), lambda h: (h, 0, 0, 0)),    # per-head BN g/b x3
        pl.BlockSpec((None, 2, H), lambda h: (h, 0, 0)),          # last-block bn1 g/b
        pl.BlockSpec((None, 2, H), lambda h: (h, 0, 0)),          # last fc1 / downsample rows
        pl.BlockSpec(memory_space=pltpu.MemorySpace.SMEM),        # per-head scalars in SMEM
    ]
    out_specs = pl.BlockSpec((None, B, 1), lambda h: (h, 0, 0))

    out = pl.pallas_call(
        _heads_kernel,
        grid=(num_bs,),
        in_specs=in_specs,
        out_specs=out_specs,
        out_shape=jax.ShapeDtypeStruct((num_bs, B, 1), jnp.float32),
        compiler_params=pltpu.CompilerParams(
            # heads are independent -> parallel (v7x splits them across its 2 TCs)
            dimension_semantics=("parallel",),
            vmem_limit_bytes=64 * 1024 * 1024,
        ),
    )(feat, w1s, w2s, bnp, bn1l, wlast, scal)

    return jnp.transpose(out[:, :, 0], (1, 0))                    # (B, num_bs)


def init_params(key, feature_input_dim, num_bs):
    """Deterministic synthetic parameters with PyTorch layouts/shapes."""
    H = _HIDDEN
    k = jax.random.split(key, 5)
    inv_h = 1.0 / jnp.sqrt(jnp.float32(H))
    inv_d = 1.0 / jnp.sqrt(jnp.float32(feature_input_dim))
    lstm = {
        "w_ih": jax.random.normal(k[0], (4 * H, feature_input_dim), jnp.float32) * inv_d,
        "w_hh": jax.random.normal(k[1], (4 * H, H), jnp.float32) * inv_h,
        "b_ih": 0.1 * jax.random.normal(k[2], (4 * H,), jnp.float32),
        "b_hh": 0.1 * jax.random.normal(k[3], (4 * H,), jnp.float32),
    }
    heads = []
    for hidx in range(num_bs):
        hk = jax.random.fold_in(k[4], hidx)
        blocks = []
        for j in range(3):
            bk = jax.random.split(jax.random.fold_in(hk, j), 6)
            blocks.append({
                "w1": jax.random.normal(bk[0], (H, H), jnp.float32) * inv_h,
                "w2": jax.random.normal(bk[1], (H, H), jnp.float32) * inv_h,
                "g1": 1.0 + 0.1 * jax.random.normal(bk[2], (H,), jnp.float32),
                "b1": 0.1 * jax.random.normal(bk[3], (H,), jnp.float32),
                "g2": 1.0 + 0.1 * jax.random.normal(bk[4], (H,), jnp.float32),
                "b2": 0.1 * jax.random.normal(bk[5], (H,), jnp.float32),
            })
        lk = jax.random.split(jax.random.fold_in(hk, 99), 9)
        last = {
            "w1": jax.random.normal(lk[0], (1, H), jnp.float32) * inv_h,
            "w2": jax.random.normal(lk[1], (1, 1), jnp.float32),
            "wd": jax.random.normal(lk[2], (1, H), jnp.float32) * inv_h,
            "g1": 1.0 + 0.1 * jax.random.normal(lk[3], (H,), jnp.float32),
            "b1": 0.1 * jax.random.normal(lk[4], (H,), jnp.float32),
            "g2": 1.0 + 0.1 * jax.random.normal(lk[5], (1,), jnp.float32),
            "b2": 0.1 * jax.random.normal(lk[6], (1,), jnp.float32),
            "gd": 1.0 + 0.1 * jax.random.normal(lk[7], (1,), jnp.float32),
            "bd": 0.1 * jax.random.normal(lk[8], (1,), jnp.float32),
        }
        heads.append({"blocks128": blocks, "last": last})
    return {"lstm": lstm, "heads": heads}


def _reference(x, params):
    """Pure-JAX reference mirroring the PyTorch forward exactly."""
    H = _HIDDEN
    B, S, _ = x.shape
    wih, whh = params["lstm"]["w_ih"], params["lstm"]["w_hh"]
    b = params["lstm"]["b_ih"] + params["lstm"]["b_hh"]
    h = jnp.zeros((B, H), jnp.float32)
    c = jnp.zeros((B, H), jnp.float32)
    for t in range(S):
        g = x[:, t, :] @ wih.T + h @ whh.T + b
        i = jax.nn.sigmoid(g[:, 0:H])
        f = jax.nn.sigmoid(g[:, H:2 * H])
        gg = jnp.tanh(g[:, 2 * H:3 * H])
        o = jax.nn.sigmoid(g[:, 3 * H:4 * H])
        c = f * c + i * gg
        h = o * jnp.tanh(c)
    feat = h                                   # lstm_out[..., -1, :]

    def bn(v, gamma, beta):
        m = v.mean(0, keepdims=True)
        var = ((v - m) ** 2).mean(0, keepdims=True)
        return gamma * (v - m) / jnp.sqrt(var + _EPS) + beta

    outs = []
    for hd in params["heads"]:
        z = feat
        for blk in hd["blocks128"]:
            o_ = jnp.maximum(bn(z, blk["g1"], blk["b1"]), 0.0) @ blk["w1"].T
            o_ = jnp.maximum(bn(o_, blk["g2"], blk["b2"]), 0.0) @ blk["w2"].T
            z = jnp.maximum(z + o_, 0.0)
        lb = hd["last"]
        o_ = jnp.maximum(bn(z, lb["g1"], lb["b1"]), 0.0) @ lb["w1"].T
        o_ = jnp.maximum(bn(o_, lb["g2"], lb["b2"]), 0.0) @ lb["w2"].T
        ident = bn(z @ lb["wd"].T, lb["gd"], lb["bd"])
        outs.append(o_ + ident)
    return jnp.concatenate(outs, axis=-1)


if __name__ == "__main__":
    key = jax.random.PRNGKey(0)
    kx, kp = jax.random.split(key)

    batch, seq, feature_input_dim, num_bs = 8, 8, 16, 3
    x = jax.random.normal(kx, (batch, seq, feature_input_dim), jnp.float32)
    params = init_params(kp, feature_input_dim, num_bs)

    out = best_gain_lstm_forward(x, params)
    out = jax.block_until_ready(out)

    ref = _reference(x, params)
    assert out.shape == (batch, num_bs)
    max_diff = float(jnp.max(jnp.abs(out - ref)))
    assert jnp.allclose(out, ref, atol=2e-3, rtol=2e-3), (
        f"mismatch vs reference, max abs diff = {max_diff}")

    print("KERNEL_OK")
</pallas_src>

<mosaic_0001>
module attributes {stable_mosaic.version = 11 : i64} {
  func.func @_lstm_kernel(%arg0: memref<64x16xf32, #tpu.memory_space<vmem>>, %arg1: memref<16x512xf32, #tpu.memory_space<vmem>>, %arg2: memref<128x512xf32, #tpu.memory_space<vmem>>, %arg3: memref<1x512xf32, #tpu.memory_space<vmem>>, %arg4: memref<8x128xf32, #tpu.memory_space<vmem>>, %arg5: memref<64x512xf32, #tpu.memory_space<vmem>>) attributes {dimension_semantics = [], scalar_prefetch = 0 : i64, scratch_operands = 1 : i64, tpu.core_type = #tpu.core_type<tc>} {
    %c0 = arith.constant 0 : index
    %c0_0 = arith.constant 0 : index
    %0 = vector.load %arg0[%c0, %c0_0] : memref<64x16xf32, #tpu.memory_space<vmem>>, vector<64x16xf32>
    %c0_1 = arith.constant 0 : index
    %c0_2 = arith.constant 0 : index
    %1 = vector.load %arg1[%c0_1, %c0_2] : memref<16x512xf32, #tpu.memory_space<vmem>>, vector<16x512xf32>
    %cst = arith.constant dense<0.000000e+00> : vector<64x512xf32>
    %2 = tpu.matmul %0, %1, %cst {dimension_numbers = #tpu.dot_dimension_numbers<[1], [0], [0], [1], [0, 0, 1, 1], [], []>} : vector<64x16xf32>, vector<16x512xf32>, vector<64x512xf32> -> vector<64x512xf32>
    %c0_3 = arith.constant 0 : index
    %c0_4 = arith.constant 0 : index
    %3 = vector.load %arg3[%c0_3, %c0_4] : memref<1x512xf32, #tpu.memory_space<vmem>>, vector<1x512xf32>
    %4 = vector.broadcast %3 : vector<1x512xf32> to vector<64x512xf32>
    %5 = arith.addf %2, %4 : vector<64x512xf32>
    %c0_5 = arith.constant 0 : index
    %c0_6 = arith.constant 0 : index
    %6 = vector.load %arg5[%c0_5, %c0_6] : memref<64x512xf32, #tpu.memory_space<vmem>>, vector<64x512xf32>
    tpu.vector_store %arg5[%c0_5, %c0_6], %5 {strides = array<i32>} : memref<64x512xf32, #tpu.memory_space<vmem>>, vector<64x512xf32>,
    %cst_7 = arith.constant 0.000000e+00 : f32
    %7 = vector.broadcast %cst_7 : f32 to vector<8x128xf32>
    %cst_8 = arith.constant 0.000000e+00 : f32
    %8 = vector.broadcast %cst_8 : f32 to vector<8x128xf32>
    %c0_i32 = arith.constant 0 : i32
    %c8_i32 = arith.constant 8 : i32
    %9 = arith.muli %c0_i32, %c8_i32 : i32
    %10 = tpu.assume_multiple %9, 8 : i32
    %c0_9 = arith.constant 0 : index
    %c0_10 = arith.constant 0 : index
    %11 = vector.load %arg2[%c0_9, %c0_10] : memref<128x512xf32, #tpu.memory_space<vmem>>, vector<128x512xf32>
    %cst_11 = arith.constant dense<0.000000e+00> : vector<8x512xf32>
    %12 = tpu.matmul %7, %11, %cst_11 {dimension_numbers = #tpu.dot_dimension_numbers<[1], [0], [0], [1], [0, 0, 1, 1], [], []>} : vector<8x128xf32>, vector<128x512xf32>, vector<8x512xf32> -> vector<8x512xf32>
    %13 = arith.index_cast %10 : i32 to index
    %c0_12 = arith.constant 0 : index
    %14 = vector.load %arg5[%13, %c0_12] : memref<64x512xf32, #tpu.memory_space<vmem>>, vector<8x512xf32>
    %15 = arith.addf %12, %14 : vector<8x512xf32>
    %16 = vector.extract_strided_slice %15 {offsets = [0, 0], sizes = [8, 128], strides = [1, 1]} : vector<8x512xf32> to vector<8x128xf32>
    %17 = arith.negf %16 : vector<8x128xf32>
    %18 = math.exp %17 : vector<8x128xf32>
    %cst_13 = arith.constant 1.000000e+00 : f32
    %19 = vector.broadcast %cst_13 : f32 to vector<8x128xf32>
    %20 = arith.addf %19, %18 : vector<8x128xf32>
    %21 = arith.divf %19, %20 : vector<8x128xf32>
    %22 = vector.extract_strided_slice %15 {offsets = [0, 128], sizes = [8, 128], strides = [1, 1]} : vector<8x512xf32> to vector<8x128xf32>
    %23 = arith.negf %22 : vector<8x128xf32>
    %24 = math.exp %23 : vector<8x128xf32>
    %cst_14 = arith.constant 1.000000e+00 : f32
    %25 = vector.broadcast %cst_14 : f32 to vector<8x128xf32>
    %26 = arith.addf %25, %24 : vector<8x128xf32>
    %27 = arith.divf %25, %26 : vector<8x128xf32>
    %28 = vector.extract_strided_slice %15 {offsets = [0, 256], sizes = [8, 128], strides = [1, 1]} : vector<8x512xf32> to vector<8x128xf32>
    %29 = math.tanh %28 : vector<8x128xf32>
    %30 = vector.extract_strided_slice %15 {offsets = [0, 384], sizes = [8, 128], strides = [1, 1]} : vector<8x512xf32> to vector<8x128xf32>
    %31 = arith.negf %30 : vector<8x128xf32>
    %32 = math.exp %31 : vector<8x128xf32>
    %cst_15 = arith.constant 1.000000e+00 : f32
    %33 = vector.broadcast %cst_15 : f32 to vector<8x128xf32>
    %34 = arith.addf %33, %32 : vector<8x128xf32>
    %35 = arith.divf %33, %34 : vector<8x128xf32>
    %36 = arith.mulf %27, %8 : vector<8x128xf32>
    %37 = arith.mulf %21, %29 : vector<8x128xf32>
    %38 = arith.addf %36, %37 : vector<8x128xf32>
    %39 = math.tanh %38 : vector<8x128xf32>
    %40 = arith.mulf %35, %39 : vector<8x128xf32>
    %c1_i32 = arith.constant 1 : i32
    %c8_i32_16 = arith.constant 8 : i32
    %41 = arith.muli %c1_i32, %c8_i32_16 : i32
    %42 = tpu.assume_multiple %41, 8 : i32
    %c0_17 = arith.constant 0 : index
    %c0_18 = arith.constant 0 : index
    %43 = vector.load %arg2[%c0_17, %c0_18] : memref<128x512xf32, #tpu.memory_space<vmem>>, vector<128x512xf32>
    %cst_19 = arith.constant dense<0.000000e+00> : vector<8x512xf32>
    %44 = tpu.matmul %40, %43, %cst_19 {dimension_numbers = #tpu.dot_dimension_numbers<[1], [0], [0], [1], [0, 0, 1, 1], [], []>} : vector<8x128xf32>, vector<128x512xf32>, vector<8x512xf32> -> vector<8x512xf32>
    %45 = arith.index_cast %42 : i32 to index
    %c0_20 = arith.constant 0 : index
    %46 = vector.load %arg5[%45, %c0_20] : memref<64x512xf32, #tpu.memory_space<vmem>>, vector<8x512xf32>
    %47 = arith.addf %44, %46 : vector<8x512xf32>
    %48 = vector.extract_strided_slice %47 {offsets = [0, 0], sizes = [8, 128], strides = [1, 1]} : vector<8x512xf32> to vector<8x128xf32>
    %49 = arith.negf %48 : vector<8x128xf32>
    %50 = math.exp %49 : vector<8x128xf32>
    %cst_21 = arith.constant 1.000000e+00 : f32
    %51 = vector.broadcast %cst_21 : f32 to vector<8x128xf32>
    %52 = arith.addf %51, %50 : vector<8x128xf32>
    %53 = arith.divf %51, %52 : vector<8x128xf32>
    %54 = vector.extract_strided_slice %47 {offsets = [0, 128], sizes = [8, 128], strides = [1, 1]} : vector<8x512xf32> to vector<8x128xf32>
    %55 = arith.negf %54 : vector<8x128xf32>
    %56 = math.exp %55 : vector<8x128xf32>
    %cst_22 = arith.constant 1.000000e+00 : f32
    %57 = vector.broadcast %cst_22 : f32 to vector<8x128xf32>
    %58 = arith.addf %57, %56 : vector<8x128xf32>
    %59 = arith.divf %57, %58 : vector<8x128xf32>
    %60 = vector.extract_strided_slice %47 {offsets = [0, 256], sizes = [8, 128], strides = [1, 1]} : vector<8x512xf32> to vector<8x128xf32>
    %61 = math.tanh %60 : vector<8x128xf32>
    %62 = vector.extract_strided_slice %47 {offsets = [0, 384], sizes = [8, 128], strides = [1, 1]} : vector<8x512xf32> to vector<8x128xf32>
    %63 = arith.negf %62 : vector<8x128xf32>
    %64 = math.exp %63 : vector<8x128xf32>
    %cst_23 = arith.constant 1.000000e+00 : f32
    %65 = vector.broadcast %cst_23 : f32 to vector<8x128xf32>
    %66 = arith.addf %65, %64 : vector<8x128xf32>
    %67 = arith.divf %65, %66 : vector<8x128xf32>
    %68 = arith.mulf %59, %38 : vector<8x128xf32>
    %69 = arith.mulf %53, %61 : vector<8x128xf32>
    %70 = arith.addf %68, %69 : vector<8x128xf32>
    %71 = math.tanh %70 : vector<8x128xf32>
    %72 = arith.mulf %67, %71 : vector<8x128xf32>
    %c2_i32 = arith.constant 2 : i32
    %c8_i32_24 = arith.constant 8 : i32
    %73 = arith.muli %c2_i32, %c8_i32_24 : i32
    %74 = tpu.assume_multiple %73, 8 : i32
    %c0_25 = arith.constant 0 : index
    %c0_26 = arith.constant 0 : index
    %75 = vector.load %arg2[%c0_25, %c0_26] : memref<128x512xf32, #tpu.memory_space<vmem>>, vector<128x512xf32>
    %cst_27 = arith.constant dense<0.000000e+00> : vector<8x512xf32>
    %76 = tpu.matmul %72, %75, %cst_27 {dimension_numbers = #tpu.dot_dimension_numbers<[1], [0], [0], [1], [0, 0, 1, 1], [], []>} : vector<8x128xf32>, vector<128x512xf32>, vector<8x512xf32> -> vector<8x512xf32>
    %77 = arith.index_cast %74 : i32 to index
    %c0_28 = arith.constant 0 : index
    %78 = vector.load %arg5[%77, %c0_28] : memref<64x512xf32, #tpu.memory_space<vmem>>, vector<8x512xf32>
    %79 = arith.addf %76, %78 : vector<8x512xf32>
    %80 = vector.extract_strided_slice %79 {offsets = [0, 0], sizes = [8, 128], strides = [1, 1]} : vector<8x512xf32> to vector<8x128xf32>
    %81 = arith.negf %80 : vector<8x128xf32>
    %82 = math.exp %81 : vector<8x128xf32>
    %cst_29 = arith.constant 1.000000e+00 : f32
    %83 = vector.broadcast %cst_29 : f32 to vector<8x128xf32>
    %84 = arith.addf %83, %82 : vector<8x128xf32>
    %85 = arith.divf %83, %84 : vector<8x128xf32>
    %86 = vector.extract_strided_slice %79 {offsets = [0, 128], sizes = [8, 128], strides = [1, 1]} : vector<8x512xf32> to vector<8x128xf32>
    %87 = arith.negf %86 : vector<8x128xf32>
    %88 = math.exp %87 : vector<8x128xf32>
    %cst_30 = arith.constant 1.000000e+00 : f32
    %89 = vector.broadcast %cst_30 : f32 to vector<8x128xf32>
    %90 = arith.addf %89, %88 : vector<8x128xf32>
    %91 = arith.divf %89, %90 : vector<8x128xf32>
    %92 = vector.extract_strided_slice %79 {offsets = [0, 256], sizes = [8, 128], strides = [1, 1]} : vector<8x512xf32> to vector<8x128xf32>
    %93 = math.tanh %92 : vector<8x128xf32>
    %94 = vector.extract_strided_slice %79 {offsets = [0, 384], sizes = [8, 128], strides = [1, 1]} : vector<8x512xf32> to vector<8x128xf32>
    %95 = arith.negf %94 : vector<8x128xf32>
    %96 = math.exp %95 : vector<8x128xf32>
    %cst_31 = arith.constant 1.000000e+00 : f32
    %97 = vector.broadcast %cst_31 : f32 to vector<8x128xf32>
    %98 = arith.addf %97, %96 : vector<8x128xf32>
    %99 = arith.divf %97, %98 : vector<8x128xf32>
    %100 = arith.mulf %91, %70 : vector<8x128xf32>
    %101 = arith.mulf %85, %93 : vector<8x128xf32>
    %102 = arith.addf %100, %101 : vector<8x128xf32>
    %103 = math.tanh %102 : vector<8x128xf32>
    %104 = arith.mulf %99, %103 : vector<8x128xf32>
    %c3_i32 = arith.constant 3 : i32
    %c8_i32_32 = arith.constant 8 : i32
    %105 = arith.muli %c3_i32, %c8_i32_32 : i32
    %106 = tpu.assume_multiple %105, 8 : i32
    %c0_33 = arith.constant 0 : index
    %c0_34 = arith.constant 0 : index
    %107 = vector.load %arg2[%c0_33, %c0_34] : memref<128x512xf32, #tpu.memory_space<vmem>>, vector<128x512xf32>
    %cst_35 = arith.constant dense<0.000000e+00> : vector<8x512xf32>
    %108 = tpu.matmul %104, %107, %cst_35 {dimension_numbers = #tpu.dot_dimension_numbers<[1], [0], [0], [1], [0, 0, 1, 1], [], []>} : vector<8x128xf32>, vector<128x512xf32>, vector<8x512xf32> -> vector<8x512xf32>
    %109 = arith.index_cast %106 : i32 to index
    %c0_36 = arith.constant 0 : index
    %110 = vector.load %arg5[%109, %c0_36] : memref<64x512xf32, #tpu.memory_space<vmem>>, vector<8x512xf32>
    %111 = arith.addf %108, %110 : vector<8x512xf32>
    %112 = vector.extract_strided_slice %111 {offsets = [0, 0], sizes = [8, 128], strides = [1, 1]} : vector<8x512xf32> to vector<8x128xf32>
    %113 = arith.negf %112 : vector<8x128xf32>
    %114 = math.exp %113 : vector<8x128xf32>
    %cst_37 = arith.constant 1.000000e+00 : f32
    %115 = vector.broadcast %cst_37 : f32 to vector<8x128xf32>
    %116 = arith.addf %115, %114 : vector<8x128xf32>
    %117 = arith.divf %115, %116 : vector<8x128xf32>
    %118 = vector.extract_strided_slice %111 {offsets = [0, 128], sizes = [8, 128], strides = [1, 1]} : vector<8x512xf32> to vector<8x128xf32>
    %119 = arith.negf %118 : vector<8x128xf32>
    %120 = math.exp %119 : vector<8x128xf32>
    %cst_38 = arith.constant 1.000000e+00 : f32
    %121 = vector.broadcast %cst_38 : f32 to vector<8x128xf32>
    %122 = arith.addf %121, %120 : vector<8x128xf32>
    %123 = arith.divf %121, %122 : vector<8x128xf32>
    %124 = vector.extract_strided_slice %111 {offsets = [0, 256], sizes = [8, 128], strides = [1, 1]} : vector<8x512xf32> to vector<8x128xf32>
    %125 = math.tanh %124 : vector<8x128xf32>
    %126 = vector.extract_strided_slice %111 {offsets = [0, 384], sizes = [8, 128], strides = [1, 1]} : vector<8x512xf32> to vector<8x128xf32>
    %127 = arith.negf %126 : vector<8x128xf32>
    %128 = math.exp %127 : vector<8x128xf32>
    %cst_39 = arith.constant 1.000000e+00 : f32
    %129 = vector.broadcast %cst_39 : f32 to vector<8x128xf32>
    %130 = arith.addf %129, %128 : vector<8x128xf32>
    %131 = arith.divf %129, %130 : vector<8x128xf32>
    %132 = arith.mulf %123, %102 : vector<8x128xf32>
    %133 = arith.mulf %117, %125 : vector<8x128xf32>
    %134 = arith.addf %132, %133 : vector<8x128xf32>
    %135 = math.tanh %134 : vector<8x128xf32>
    %136 = arith.mulf %131, %135 : vector<8x128xf32>
    %c4_i32 = arith.constant 4 : i32
    %c8_i32_40 = arith.constant 8 : i32
    %137 = arith.muli %c4_i32, %c8_i32_40 : i32
    %138 = tpu.assume_multiple %137, 8 : i32
    %c0_41 = arith.constant 0 : index
    %c0_42 = arith.constant 0 : index
    %139 = vector.load %arg2[%c0_41, %c0_42] : memref<128x512xf32, #tpu.memory_space<vmem>>, vector<128x512xf32>
    %cst_43 = arith.constant dense<0.000000e+00> : vector<8x512xf32>
    %140 = tpu.matmul %136, %139, %cst_43 {dimension_numbers = #tpu.dot_dimension_numbers<[1], [0], [0], [1], [0, 0, 1, 1], [], []>} : vector<8x128xf32>, vector<128x512xf32>, vector<8x512xf32> -> vector<8x512xf32>
    %141 = arith.index_cast %138 : i32 to index
    %c0_44 = arith.constant 0 : index
    %142 = vector.load %arg5[%141, %c0_44] : memref<64x512xf32, #tpu.memory_space<vmem>>, vector<8x512xf32>
    %143 = arith.addf %140, %142 : vector<8x512xf32>
    %144 = vector.extract_strided_slice %143 {offsets = [0, 0], sizes = [8, 128], strides = [1, 1]} : vector<8x512xf32> to vector<8x128xf32>
    %145 = arith.negf %144 : vector<8x128xf32>
    %146 = math.exp %145 : vector<8x128xf32>
    %cst_45 = arith.constant 1.000000e+00 : f32
    %147 = vector.broadcast %cst_45 : f32 to vector<8x128xf32>
    %148 = arith.addf %147, %146 : vector<8x128xf32>
    %149 = arith.divf %147, %148 : vector<8x128xf32>
    %150 = vector.extract_strided_slice %143 {offsets = [0, 128], sizes = [8, 128], strides = [1, 1]} : vector<8x512xf32> to vector<8x128xf32>
    %151 = arith.negf %150 : vector<8x128xf32>
    %152 = math.exp %151 : vector<8x128xf32>
    %cst_46 = arith.constant 1.000000e+00 : f32
    %153 = vector.broadcast %cst_46 : f32 to vector<8x128xf32>
    %154 = arith.addf %153, %152 : vector<8x128xf32>
    %155 = arith.divf %153, %154 : vector<8x128xf32>
    %156 = vector.extract_strided_slice %143 {offsets = [0, 256], sizes = [8, 128], strides = [1, 1]} : vector<8x512xf32> to vector<8x128xf32>
    %157 = math.tanh %156 : vector<8x128xf32>
    %158 = vector.extract_strided_slice %143 {offsets = [0, 384], sizes = [8, 128], strides = [1, 1]} : vector<8x512xf32> to vector<8x128xf32>
    %159 = arith.negf %158 : vector<8x128xf32>
    %160 = math.exp %159 : vector<8x128xf32>
    %cst_47 = arith.constant 1.000000e+00 : f32
    %161 = vector.broadcast %cst_47 : f32 to vector<8x128xf32>
    %162 = arith.addf %161, %160 : vector<8x128xf32>
    %163 = arith.divf %161, %162 : vector<8x128xf32>
    %164 = arith.mulf %155, %134 : vector<8x128xf32>
    %165 = arith.mulf %149, %157 : vector<8x128xf32>
    %166 = arith.addf %164, %165 : vector<8x128xf32>
    %167 = math.tanh %166 : vector<8x128xf32>
    %168 = arith.mulf %163, %167 : vector<8x128xf32>
    %c5_i32 = arith.constant 5 : i32
    %c8_i32_48 = arith.constant 8 : i32
    %169 = arith.muli %c5_i32, %c8_i32_48 : i32
    %170 = tpu.assume_multiple %169, 8 : i32
    %c0_49 = arith.constant 0 : index
    %c0_50 = arith.constant 0 : index
    %171 = vector.load %arg2[%c0_49, %c0_50] : memref<128x512xf32, #tpu.memory_space<vmem>>, vector<128x512xf32>
    %cst_51 = arith.constant dense<0.000000e+00> : vector<8x512xf32>
    %172 = tpu.matmul %168, %171, %cst_51 {dimension_numbers = #tpu.dot_dimension_numbers<[1], [0], [0], [1], [0, 0, 1, 1], [], []>} : vector<8x128xf32>, vector<128x512xf32>, vector<8x512xf32> -> vector<8x512xf32>
    %173 = arith.index_cast %170 : i32 to index
    %c0_52 = arith.constant 0 : index
    %174 = vector.load %arg5[%173, %c0_52] : memref<64x512xf32, #tpu.memory_space<vmem>>, vector<8x512xf32>
    %175 = arith.addf %172, %174 : vector<8x512xf32>
    %176 = vector.extract_strided_slice %175 {offsets = [0, 0], sizes = [8, 128], strides = [1, 1]} : vector<8x512xf32> to vector<8x128xf32>
    %177 = arith.negf %176 : vector<8x128xf32>
    %178 = math.exp %177 : vector<8x128xf32>
    %cst_53 = arith.constant 1.000000e+00 : f32
    %179 = vector.broadcast %cst_53 : f32 to vector<8x128xf32>
    %180 = arith.addf %179, %178 : vector<8x128xf32>
    %181 = arith.divf %179, %180 : vector<8x128xf32>
    %182 = vector.extract_strided_slice %175 {offsets = [0, 128], sizes = [8, 128], strides = [1, 1]} : vector<8x512xf32> to vector<8x128xf32>
    %183 = arith.negf %182 : vector<8x128xf32>
    %184 = math.exp %183 : vector<8x128xf32>
    %cst_54 = arith.constant 1.000000e+00 : f32
    %185 = vector.broadcast %cst_54 : f32 to vector<8x128xf32>
    %186 = arith.addf %185, %184 : vector<8x128xf32>
    %187 = arith.divf %185, %186 : vector<8x128xf32>
    %188 = vector.extract_strided_slice %175 {offsets = [0, 256], sizes = [8, 128], strides = [1, 1]} : vector<8x512xf32> to vector<8x128xf32>
    %189 = math.tanh %188 : vector<8x128xf32>
    %190 = vector.extract_strided_slice %175 {offsets = [0, 384], sizes = [8, 128], strides = [1, 1]} : vector<8x512xf32> to vector<8x128xf32>
    %191 = arith.negf %190 : vector<8x128xf32>
    %192 = math.exp %191 : vector<8x128xf32>
    %cst_55 = arith.constant 1.000000e+00 : f32
    %193 = vector.broadcast %cst_55 : f32 to vector<8x128xf32>
    %194 = arith.addf %193, %192 : vector<8x128xf32>
    %195 = arith.divf %193, %194 : vector<8x128xf32>
    %196 = arith.mulf %187, %166 : vector<8x128xf32>
    %197 = arith.mulf %181, %189 : vector<8x128xf32>
    %198 = arith.addf %196, %197 : vector<8x128xf32>
    %199 = math.tanh %198 : vector<8x128xf32>
    %200 = arith.mulf %195, %199 : vector<8x128xf32>
    %c6_i32 = arith.constant 6 : i32
    %c8_i32_56 = arith.constant 8 : i32
    %201 = arith.muli %c6_i32, %c8_i32_56 : i32
    %202 = tpu.assume_multiple %201, 8 : i32
    %c0_57 = arith.constant 0 : index
    %c0_58 = arith.constant 0 : index
    %203 = vector.load %arg2[%c0_57, %c0_58] : memref<128x512xf32, #tpu.memory_space<vmem>>, vector<128x512xf32>
    %cst_59 = arith.constant dense<0.000000e+00> : vector<8x512xf32>
    %204 = tpu.matmul %200, %203, %cst_59 {dimension_numbers = #tpu.dot_dimension_numbers<[1], [0], [0], [1], [0, 0, 1, 1], [], []>} : vector<8x128xf32>, vector<128x512xf32>, vector<8x512xf32> -> vector<8x512xf32>
    %205 = arith.index_cast %202 : i32 to index
    %c0_60 = arith.constant 0 : index
    %206 = vector.load %arg5[%205, %c0_60] : memref<64x512xf32, #tpu.memory_space<vmem>>, vector<8x512xf32>
    %207 = arith.addf %204, %206 : vector<8x512xf32>
    %208 = vector.extract_strided_slice %207 {offsets = [0, 0], sizes = [8, 128], strides = [1, 1]} : vector<8x512xf32> to vector<8x128xf32>
    %209 = arith.negf %208 : vector<8x128xf32>
    %210 = math.exp %209 : vector<8x128xf32>
    %cst_61 = arith.constant 1.000000e+00 : f32
    %211 = vector.broadcast %cst_61 : f32 to vector<8x128xf32>
    %212 = arith.addf %211, %210 : vector<8x128xf32>
    %213 = arith.divf %211, %212 : vector<8x128xf32>
    %214 = vector.extract_strided_slice %207 {offsets = [0, 128], sizes = [8, 128], strides = [1, 1]} : vector<8x512xf32> to vector<8x128xf32>
    %215 = arith.negf %214 : vector<8x128xf32>
    %216 = math.exp %215 : vector<8x128xf32>
    %cst_62 = arith.constant 1.000000e+00 : f32
    %217 = vector.broadcast %cst_62 : f32 to vector<8x128xf32>
    %218 = arith.addf %217, %216 : vector<8x128xf32>
    %219 = arith.divf %217, %218 : vector<8x128xf32>
    %220 = vector.extract_strided_slice %207 {offsets = [0, 256], sizes = [8, 128], strides = [1, 1]} : vector<8x512xf32> to vector<8x128xf32>
    %221 = math.tanh %220 : vector<8x128xf32>
    %222 = vector.extract_strided_slice %207 {offsets = [0, 384], sizes = [8, 128], strides = [1, 1]} : vector<8x512xf32> to vector<8x128xf32>
    %223 = arith.negf %222 : vector<8x128xf32>
    %224 = math.exp %223 : vector<8x128xf32>
    %cst_63 = arith.constant 1.000000e+00 : f32
    %225 = vector.broadcast %cst_63 : f32 to vector<8x128xf32>
    %226 = arith.addf %225, %224 : vector<8x128xf32>
    %227 = arith.divf %225, %226 : vector<8x128xf32>
    %228 = arith.mulf %219, %198 : vector<8x128xf32>
    %229 = arith.mulf %213, %221 : vector<8x128xf32>
    %230 = arith.addf %228, %229 : vector<8x128xf32>
    %231 = math.tanh %230 : vector<8x128xf32>
    %232 = arith.mulf %227, %231 : vector<8x128xf32>
    %c7_i32 = arith.constant 7 : i32
    %c8_i32_64 = arith.constant 8 : i32
    %233 = arith.muli %c7_i32, %c8_i32_64 : i32
    %234 = tpu.assume_multiple %233, 8 : i32
    %c0_65 = arith.constant 0 : index
    %c0_66 = arith.constant 0 : index
    %235 = vector.load %arg2[%c0_65, %c0_66] : memref<128x512xf32, #tpu.memory_space<vmem>>, vector<128x512xf32>
    %cst_67 = arith.constant dense<0.000000e+00> : vector<8x512xf32>
    %236 = tpu.matmul %232, %235, %cst_67 {dimension_numbers = #tpu.dot_dimension_numbers<[1], [0], [0], [1], [0, 0, 1, 1], [], []>} : vector<8x128xf32>, vector<128x512xf32>, vector<8x512xf32> -> vector<8x512xf32>
    %237 = arith.index_cast %234 : i32 to index
    %c0_68 = arith.constant 0 : index
    %238 = vector.load %arg5[%237, %c0_68] : memref<64x512xf32, #tpu.memory_space<vmem>>, vector<8x512xf32>
    %239 = arith.addf %236, %238 : vector<8x512xf32>
    %240 = vector.extract_strided_slice %239 {offsets = [0, 0], sizes = [8, 128], strides = [1, 1]} : vector<8x512xf32> to vector<8x128xf32>
    %241 = arith.negf %240 : vector<8x128xf32>
    %242 = math.exp %241 : vector<8x128xf32>
    %cst_69 = arith.constant 1.000000e+00 : f32
    %243 = vector.broadcast %cst_69 : f32 to vector<8x128xf32>
    %244 = arith.addf %243, %242 : vector<8x128xf32>
    %245 = arith.divf %243, %244 : vector<8x128xf32>
    %246 = vector.extract_strided_slice %239 {offsets = [0, 128], sizes = [8, 128], strides = [1, 1]} : vector<8x512xf32> to vector<8x128xf32>
    %247 = arith.negf %246 : vector<8x128xf32>
    %248 = math.exp %247 : vector<8x128xf32>
    %cst_70 = arith.constant 1.000000e+00 : f32
    %249 = vector.broadcast %cst_70 : f32 to vector<8x128xf32>
    %250 = arith.addf %249, %248 : vector<8x128xf32>
    %251 = arith.divf %249, %250 : vector<8x128xf32>
    %252 = vector.extract_strided_slice %239 {offsets = [0, 256], sizes = [8, 128], strides = [1, 1]} : vector<8x512xf32> to vector<8x128xf32>
    %253 = math.tanh %252 : vector<8x128xf32>
    %254 = vector.extract_strided_slice %239 {offsets = [0, 384], sizes = [8, 128], strides = [1, 1]} : vector<8x512xf32> to vector<8x128xf32>
    %255 = arith.negf %254 : vector<8x128xf32>
    %256 = math.exp %255 : vector<8x128xf32>
    %cst_71 = arith.constant 1.000000e+00 : f32
    %257 = vector.broadcast %cst_71 : f32 to vector<8x128xf32>
    %258 = arith.addf %257, %256 : vector<8x128xf32>
    %259 = arith.divf %257, %258 : vector<8x128xf32>
    %260 = arith.mulf %251, %230 : vector<8x128xf32>
    %261 = arith.mulf %245, %253 : vector<8x128xf32>
    %262 = arith.addf %260, %261 : vector<8x128xf32>
    %263 = math.tanh %262 : vector<8x128xf32>
    %264 = arith.mulf %259, %263 : vector<8x128xf32>
    %c8_i32_72 = arith.constant 8 : i32
    %c0_73 = arith.constant 0 : index
    %c0_74 = arith.constant 0 : index
    %265 = vector.load %arg4[%c0_73, %c0_74] : memref<8x128xf32, #tpu.memory_space<vmem>>, vector<8x128xf32>
    tpu.vector_store %arg4[%c0_73, %c0_74], %264 {strides = array<i32>} : memref<8x128xf32, #tpu.memory_space<vmem>>, vector<8x128xf32>,
    return
  }
}

</mosaic_0001>

<bundles_post_ra>
// kernel: tpu_custom_call.1
= control target key start
LH: loop header
LB: loop body
LE: loop exit
PB: predicated region body
PF: predicated region fallthrough
CT: control target
= control target key end

     0   :  { %9 = vsyncpa [#allocation4], 0  ;;  %s2890_s0 = inlined_call_operand.vmem [shape: f32[64,16], index: 0, kind: input, shape index: {}]   ;;  %s2891_s1 = inlined_call_operand.vmem [shape: f32[16,512], index: 1, kind: input, shape index: {}]   ;;  %s2892_s2 = inlined_call_operand.hbm [shape: f32[128,512], index: 2, kind: input, shape index: {}]   ;;  %s2893_s3 = inlined_call_operand.vmem [shape: f32[1,512], index: 3, kind: input, shape index: {}]   ;;  %s2894_s4 = inlined_call_operand.hbm [shape: f32[8,128], index: 4, kind: output, shape index: {}]  }
   0x1   :  { %10 = vsyncpa [#allocation5], 0  ;;  %s19_s17 = sshll.u32 %s2892_s2, 4  ;;  %s1875_s18 = smov [#allocation3]   ;;  %s20_s17 = int_to_ptr.hbm [resolvable:$true] %s19_s17 }
   0x2   :  { %s21_s19 = sshll.u32 %s1875_s18, 4  ;;  %s1876_s20 = smov 512   ;;  %s22_s19 = int_to_ptr.vmem [resolvable:$true] %s21_s19 }
   0x3   :  { %s1877_s21 = smov 32  }
   0x4   :  { %27 = dma.hbm_to_vmem [thread:$0]  %s20_s17, 8192, %s22_s19, [#allocation4], %s1876_s20, %s1876_s20, %s1877_s21  }
   0x5   :  { %1871 = dma.done.wait [#allocation4], 8192  }
   0x6   :  { %1872 = vsyncadd [#allocation4], 4294959104  ;;  %v46_v0 = vld [vmem:[%s2891_s1 + $0x20] sm:$0xff]  ;;  %v47_v1 = vld [vmem:[%s2891_s1 + $0x28] sm:$0xff]  ;;  %vm60_vm0 = vcmask 130048   ;;  %s1553_s29 = sshll.u32 %s2894_s4, 4  ;;  %s1554_s29 = int_to_ptr.hbm [resolvable:$true] %s1553_s29 }
   0x7   :  { %v48_v2 = vld [vmem:[%s2891_s1 + $0x30] sm:$0xff]  ;;  %99 = vmatpush.msra.mxu0 %v46_v0  ;;  %140 = vmatpush.msra.mxu1 %v47_v1  ;;  %v49_v3 = vld [vmem:[%s2891_s1 + $0x38] sm:$0xff]  ;;  %v42_v4 = vld [vmem:[%s2891_s1] sm:$0xff] }
   0x8   :  { %v43_v5 = vld [vmem:[%s2891_s1 + $0x8] sm:$0xff]  ;;  %181 = vmatpush.msra.mxu2 %v48_v2  ;;  %222 = vmatpush.msra.mxu3 %v49_v3  ;;  %v44_v6 = vld [vmem:[%s2891_s1 + $0x10] sm:$0xff]  ;;  %v45_v7 = vld [vmem:[%s2891_s1 + $0x18] sm:$0xff] }
   0x9   :  { %v34_v8 = vld [vmem:[%s2890_s0] sm:$0xff]  ;;  %100 = vmatpush.msra.mxu0 %v42_v4  ;;  %141 = vmatpush.msra.mxu1 %v43_v5  ;;  %v1937_v10 = vld [vmem:[#allocation3 + $0x1e8] sm:$0xff]  ;;  %v1941_v11 = vld [vmem:[#allocation3 + $0x1f8] sm:$0xff] }
   0xa   :  { %182 = vmatpush.msra.mxu2 %v44_v6  ;;  %223 = vmatpush.msra.mxu3 %v45_v7  ;;  %v1935_v9 = vld [vmem:[#allocation3 + $0x1e0] sm:$0xff]  ;;  %v1947_v13 = vld [vmem:[#allocation3 + $0x1c8] sm:$0xff]  ;;  %v1951_v14 = vld [vmem:[#allocation3 + $0x1d8] sm:$0xff] }
   0xb   :  { %1570 = vmatmul.msk.f32.vlgmr.msra.gmra.mxu0 %vm60_vm0, %v34_v8  ;;  %1578 = vmatmul.msk.f32.vlgmr.msra.gmra.mxu1 %vm60_vm0, %v34_v8  ;;  %v1945_v12 = vld [vmem:[#allocation3 + $0x1c0] sm:$0xff]  ;;  %v1953_v15 = vld [vmem:[#allocation3 + $0x1f0] sm:$0xff]  ;;  %v1958_v17 = vld [vmem:[#allocation3 + $0x1a8] sm:$0xff] }
   0xc   :  { %1586 = vmatmul.msk.f32.vlgmr.msra.gmra.mxu2 %vm60_vm0, %v34_v8  ;;  %1594 = vmatmul.msk.f32.vlgmr.msra.gmra.mxu3 %vm60_vm0, %v34_v8  ;;  %v1956_v16 = vld [vmem:[#allocation3 + $0x1a0] sm:$0xff]  ;;  %v1961_v18 = vld [vmem:[#allocation3 + $0x1d0] sm:$0xff]  ;;  %v1965_v19 = vld [vmem:[#allocation3 + $0x1b8] sm:$0xff] }
   0xd   :  { %352 = vmatpush.msrb.mxu0 %v1935_v9  ;;  %372 = vmatpush.msrb.mxu1 %v1937_v10  ;;  %v35_v20 = vld [vmem:[%s2890_s0 + $0x8] sm:$0xff]  ;;  %v1972_v21 = vld [vmem:[#allocation3 + $0x1b0] sm:$0xff]  ;;  %v1976_v22 = vld [vmem:[#allocation3 + $0x180] sm:$0xff] }
   0xe   :  { %412 = vmatpush.msrb.mxu3 %v1941_v11  ;;  %392 = vmatpush.msrb.mxu2 %v1953_v15  ;;  %v1978_v23 = vld [vmem:[#allocation3 + $0x188] sm:$0xff]  ;;  %v1984_v24 = vld [vmem:[#allocation3 + $0x198] sm:$0xff]  ;;  %v1986_v25 = vld [vmem:[#allocation3 + $0x190] sm:$0xff] }
   0xf   :  { %353 = vmatpush.msrb.mxu0 %v1945_v12  ;;  %373 = vmatpush.msrb.mxu1 %v1947_v13  ;;  %v1990_v26 = vld [vmem:[#allocation3 + $0x160] sm:$0xff]  ;;  %v1992_v27 = vld [vmem:[#allocation3 + $0x168] sm:$0xff]  ;;  %v1996_v28 = vld [vmem:[#allocation3 + $0x178] sm:$0xff] }
  0x10   :  { %413 = vmatpush.msrb.mxu3 %v1951_v14  ;;  %393 = vmatpush.msrb.mxu2 %v1961_v18  ;;  %v1998_v29 = vld [vmem:[#allocation3 + $0x170] sm:$0xff]  ;;  %v2001_v30 = vld [vmem:[#allocation3 + $0x140] sm:$0xff]  ;;  %v2003_v31 = vld [vmem:[#allocation3 + $0x148] sm:$0xff] }
  0x11   :  { %354 = vmatpush.msrb.mxu0 %v1956_v16  ;;  %374 = vmatpush.msrb.mxu1 %v1958_v17  ;;  %v2008_v32 = vld [vmem:[#allocation3 + $0x158] sm:$0xff]  ;;  %v2010_v33 = vld [vmem:[#allocation3 + $0x150] sm:$0xff]  ;;  %v2019_v35 = vld [vmem:[#allocation3 + $0x120] sm:$0xff] }
  0x12   :  { %414 = vmatpush.msrb.mxu3 %v1965_v19  ;;  %394 = vmatpush.msrb.mxu2 %v1972_v21  ;;  %v36_v34 = vld [vmem:[%s2890_s0 + $0x10] sm:$0xff]  ;;  %v2021_v36 = vld [vmem:[#allocation3 + $0x128] sm:$0xff]  ;;  %v2027_v37 = vld [vmem:[#allocation3 + $0x138] sm:$0xff] }
  0x13   :  { %1571 = vmatmul.msk.f32.gmra.mxu0 %vm60_vm0, %v35_v20  ;;  %1579 = vmatmul.msk.f32.gmra.mxu1 %vm60_vm0, %v35_v20  ;;  %v2029_v38 = vld [vmem:[#allocation3 + $0x130] sm:$0xff]  ;;  %v2033_v39 = vld [vmem:[#allocation3 + $0x100] sm:$0xff]  ;;  %v2035_v40 = vld [vmem:[#allocation3 + $0x108] sm:$0xff] }
  0x14   :  { %1587 = vmatmul.msk.f32.gmra.mxu2 %vm60_vm0, %v35_v20  ;;  %1595 = vmatmul.msk.f32.gmra.mxu3 %vm60_vm0, %v35_v20  ;;  %v2039_v41 = vld [vmem:[#allocation3 + $0x118] sm:$0xff]  ;;  %v2041_v42 = vld [vmem:[#allocation3 + $0x110] sm:$0xff]  ;;  %v2044_v43 = vld [vmem:[#allocation3 + $0xe0] sm:$0xff] }
  0x15   :  { %355 = vmatpush.msrb.mxu0 %v1976_v22  ;;  %375 = vmatpush.msrb.mxu1 %v1978_v23  ;;  %v2046_v44 = vld [vmem:[#allocation3 + $0xe8] sm:$0xff]  ;;  %v2051_v45 = vld [vmem:[#allocation3 + $0xf8] sm:$0xff]  ;;  %v2053_v46 = vld [vmem:[#allocation3 + $0xf0] sm:$0xff] }
  0x16   :  { %415 = vmatpush.msrb.mxu3 %v1984_v24  ;;  %395 = vmatpush.msrb.mxu2 %v1986_v25  ;;  %v37_v47 = vld [vmem:[%s2890_s0 + $0x18] sm:$0xff]  ;;  %v2062_v48 = vld [vmem:[#allocation3 + $0xc0] sm:$0xff]  ;;  %v2064_v49 = vld [vmem:[#allocation3 + $0xc8] sm:$0xff] }
  0x17   :  { %356 = vmatpush.msrb.mxu0 %v1990_v26  ;;  %376 = vmatpush.msrb.mxu1 %v1992_v27  ;;  %v2070_v50 = vld [vmem:[#allocation3 + $0xd8] sm:$0xff]  ;;  %v2072_v51 = vld [vmem:[#allocation3 + $0xd0] sm:$0xff]  ;;  %v2076_v52 = vld [vmem:[#allocation3 + $0xa0] sm:$0xff] }
  0x18   :  { %416 = vmatpush.msrb.mxu3 %v1996_v28  ;;  %396 = vmatpush.msrb.mxu2 %v1998_v29  ;;  %2982 = vst [vmem:[#allocation9_spill] sm:$0xff] %v2070_v50  ;;  %v2078_v53 = vld [vmem:[#allocation3 + $0xa8] sm:$0xff]  ;;  %v2082_v54 = vld [vmem:[#allocation3 + $0xb8] sm:$0xff]  ;;  %v2084_v55 = vld [vmem:[#allocation3 + $0xb0] sm:$0xff] }
  0x19   :  { %357 = vmatpush.msrb.mxu0 %v2001_v30  ;;  %377 = vmatpush.msrb.mxu1 %v2003_v31  ;;  %2983 = vst [vmem:[#allocation10_spill] sm:$0xff] %v2072_v51  ;;  %v2087_v56 = vld [vmem:[#allocation3 + $0x80] sm:$0xff]  ;;  %v2089_v57 = vld [vmem:[#allocation3 + $0x88] sm:$0xff]  ;;  %v2094_v58 = vld [vmem:[#allocation3 + $0x98] sm:$0xff] }
  0x1a   :  { %417 = vmatpush.msrb.mxu3 %v2008_v32  ;;  %397 = vmatpush.msrb.mxu2 %v2010_v33  ;;  %2984 = vst [vmem:[#allocation11_spill] sm:$0xff] %v2076_v52  ;;  %v2096_v59 = vld [vmem:[#allocation3 + $0x90] sm:$0xff]  ;;  %v38_v60 = vld [vmem:[%s2890_s0 + $0x20] sm:$0xff]  ;;  %v2107_v62 = vld [vmem:[#allocation3 + $0x68] sm:$0xff] }
  0x1b   :  { %1572 = vmatmul.msk.f32.gmra.mxu0 %vm60_vm0, %v36_v34  ;;  %1580 = vmatmul.msk.f32.gmra.mxu1 %vm60_vm0, %v36_v34  ;;  %2985 = vst [vmem:[#allocation12_spill] sm:$0xff] %v2078_v53  ;;  %v2105_v61 = vld [vmem:[#allocation3 + $0x60] sm:$0xff]  ;;  %v2113_v63 = vld [vmem:[#allocation3 + $0x78] sm:$0xff]  ;;  %v2115_v0 = vld [vmem:[#allocation3 + $0x70] sm:$0xff] }
  0x1c   :  { %1588 = vmatmul.msk.f32.gmra.mxu2 %vm60_vm0, %v36_v34  ;;  %1596 = vmatmul.msk.f32.gmra.mxu3 %vm60_vm0, %v36_v34  ;;  %2986 = vst [vmem:[#allocation13_spill] sm:$0xff] %v2082_v54  ;;  %v2119_v1 = vld [vmem:[#allocation3 + $0x40] sm:$0xff]  ;;  %v2121_v2 = vld [vmem:[#allocation3 + $0x48] sm:$0xff]  ;;  %v2125_v3 = vld [vmem:[#allocation3 + $0x58] sm:$0xff] }
  0x1d   :  { %358 = vmatpush.msrb.mxu0 %v2019_v35  ;;  %378 = vmatpush.msrb.mxu1 %v2021_v36  ;;  %2987 = vst [vmem:[#allocation14_spill] sm:$0xff] %v2084_v55  ;;  %v2127_v4 = vld [vmem:[#allocation3 + $0x50] sm:$0xff]  ;;  %v2130_v5 = vld [vmem:[#allocation3 + $0x20] sm:$0xff]  ;;  %v2132_v6 = vld [vmem:[#allocation3 + $0x28] sm:$0xff] }
  0x1e   :  { %418 = vmatpush.msrb.mxu3 %v2027_v37  ;;  %398 = vmatpush.msrb.mxu2 %v2029_v38  ;;  %2988 = vst [vmem:[#allocation15_spill] sm:$0xff] %v2087_v56  ;;  %v2137_v7 = vld [vmem:[#allocation3 + $0x30] sm:$0xff]  ;;  %v2139_v8 = vld [vmem:[#allocation3 + $0x38] sm:$0xff]  ;;  %v39_v20 = vld [vmem:[%s2890_s0 + $0x28] sm:$0xff] }
  0x1f   :  { %359 = vmatpush.msrb.mxu0 %v2033_v39  ;;  %379 = vmatpush.msrb.mxu1 %v2035_v40  ;;  %2989 = vst [vmem:[#allocation16_spill] sm:$0xff] %v2089_v57  ;;  %v2148_v34 = vld [vmem:[#allocation3] sm:$0xff] }
  0x20   :  { %419 = vmatpush.msrb.mxu3 %v2039_v41  ;;  %399 = vmatpush.msrb.mxu2 %v2041_v42  ;;  %2990 = vst [vmem:[#allocation17_spill] sm:$0xff] %v2094_v58 }
  0x21   :  { %360 = vmatpush.msrb.mxu0 %v2044_v43  ;;  %380 = vmatpush.msrb.mxu1 %v2046_v44  ;;  %2991 = vst [vmem:[#allocation18_spill] sm:$0xff] %v2096_v59 }
  0x22   :  { %420 = vmatpush.msrb.mxu3 %v2051_v45  ;;  %400 = vmatpush.msrb.mxu2 %v2053_v46  ;;  %2992 = vst [vmem:[#allocation19_spill] sm:$0xff] %v2105_v61 }
  0x23   :  { %1573 = vmatmul.msk.f32.gmra.mxu0 %vm60_vm0, %v37_v47  ;;  %1581 = vmatmul.msk.f32.gmra.mxu1 %vm60_vm0, %v37_v47  ;;  %2993 = vst [vmem:[#allocation20_spill] sm:$0xff] %v2107_v62 }
  0x24   :  { %1589 = vmatmul.msk.f32.gmra.mxu2 %vm60_vm0, %v37_v47  ;;  %1597 = vmatmul.msk.f32.gmra.mxu3 %vm60_vm0, %v37_v47  ;;  %2994 = vst [vmem:[#allocation21_spill] sm:$0xff] %v2113_v63  ;;  %v2150_v47 = vld [vmem:[#allocation3 + $0x8] sm:$0xff] }
  0x25   :  { %361 = vmatpush.msrb.mxu0 %v2062_v48  ;;  %381 = vmatpush.msrb.mxu1 %v2064_v49  ;;  %2995 = vst [vmem:[#allocation22_spill] sm:$0xff] %v2115_v0 }
  0x26   :  { %421 = vmatpush.msrb.mxu3 %v2070_v50  ;;  %401 = vmatpush.msrb.mxu2 %v2072_v51  ;;  %2996 = vst [vmem:[#allocation23_spill] sm:$0xff] %v2119_v1 }
  0x27   :  { %362 = vmatpush.msrb.mxu0 %v2076_v52  ;;  %382 = vmatpush.msrb.mxu1 %v2078_v53  ;;  %2997 = vst [vmem:[#allocation24_spill] sm:$0xff] %v2121_v2 }
  0x28   :  { %422 = vmatpush.msrb.mxu3 %v2082_v54  ;;  %402 = vmatpush.msrb.mxu2 %v2084_v55  ;;  %2998 = vst [vmem:[#allocation25_spill] sm:$0xff] %v2125_v3 }
  0x29   :  { %363 = vmatpush.msrb.mxu0 %v2087_v56  ;;  %383 = vmatpush.msrb.mxu1 %v2089_v57  ;;  %2999 = vst [vmem:[#allocation26_spill] sm:$0xff] %v2127_v4 }
  0x2a   :  { %423 = vmatpush.msrb.mxu3 %v2094_v58  ;;  %403 = vmatpush.msrb.mxu2 %v2096_v59  ;;  %3000 = vst [vmem:[#allocation27_spill] sm:$0xff] %v2130_v5 }
  0x2b   :  { %1574 = vmatmul.msk.f32.gmra.mxu0 %vm60_vm0, %v38_v60  ;;  %1582 = vmatmul.msk.f32.gmra.mxu1 %vm60_vm0, %v38_v60  ;;  %3001 = vst [vmem:[#allocation28_spill] sm:$0xff] %v2132_v6 }
  0x2c   :  { %1590 = vmatmul.msk.f32.gmra.mxu2 %vm60_vm0, %v38_v60  ;;  %1598 = vmatmul.msk.f32.gmra.mxu3 %vm60_vm0, %v38_v60  ;;  %3002 = vst [vmem:[#allocation29_spill] sm:$0xff] %v2137_v7  ;;  %v2156_v60 = vld [vmem:[#allocation3 + $0x10] sm:$0xff] }
  0x2d   :  { %364 = vmatpush.msrb.mxu0 %v2105_v61  ;;  %384 = vmatpush.msrb.mxu1 %v2107_v62  ;;  %3003 = vst [vmem:[#allocation30_spill] sm:$0xff] %v2139_v8 }
  0x2e   :  { %424 = vmatpush.msrb.mxu3 %v2113_v63  ;;  %404 = vmatpush.msrb.mxu2 %v2115_v0  ;;  %3004 = vst [vmem:[#allocation31_spill] sm:$0xff] %v2148_v34 }
  0x2f   :  { %365 = vmatpush.msrb.mxu0 %v2119_v1  ;;  %385 = vmatpush.msrb.mxu1 %v2121_v2  ;;  %3005 = vst [vmem:[#allocation32_spill] sm:$0xff] %v2150_v47 }
  0x30   :  { %425 = vmatpush.msrb.mxu3 %v2125_v3  ;;  %405 = vmatpush.msrb.mxu2 %v2127_v4  ;;  %3006 = vst [vmem:[#allocation33_spill] sm:$0xff] %v2156_v60  ;;  %v2158_v3 = vld [vmem:[#allocation3 + $0x18] sm:$0xff] }
  0x31   :  { %366 = vmatpush.msrb.mxu0 %v2130_v5  ;;  %386 = vmatpush.msrb.mxu1 %v2132_v6  ;;  %3007 = vst [vmem:[#allocation34_spill] sm:$0xff] %v2158_v3 }
  0x32   :  { %406 = vmatpush.msrb.mxu2 %v2137_v7  ;;  %426 = vmatpush.msrb.mxu3 %v2139_v8  ;;  %v40_v8 = vld [vmem:[%s2890_s0 + $0x30] sm:$0xff] }
  0x33   :  { %1575 = vmatmul.msk.f32.gmra.mxu0 %vm60_vm0, %v39_v20  ;;  %1583 = vmatmul.msk.f32.gmra.mxu1 %vm60_vm0, %v39_v20 }
  0x34   :  { %1591 = vmatmul.msk.f32.gmra.mxu2 %vm60_vm0, %v39_v20  ;;  %1599 = vmatmul.msk.f32.gmra.mxu3 %vm60_vm0, %v39_v20  ;;  %v41_v20 = vld [vmem:[%s2890_s0 + $0x38] sm:$0xff] }
  0x35   :  { %367 = vmatpush.msrb.mxu0 %v2148_v34  ;;  %387 = vmatpush.msrb.mxu1 %v2150_v47 }
  0x36   :  { %407 = vmatpush.msrb.mxu2 %v2156_v60  ;;  %427 = vmatpush.msrb.mxu3 %v2158_v3 }
  0x37   :  { %502 = vmatpush.msra.mxu0 %v1935_v9  ;;  %522 = vmatpush.msra.mxu1 %v1937_v10 }
  0x38   :  { %542 = vmatpush.msra.mxu2 %v1953_v15  ;;  %562 = vmatpush.msra.mxu3 %v1941_v11 }
  0x39   :  { %503 = vmatpush.msra.mxu0 %v1945_v12  ;;  %523 = vmatpush.msra.mxu1 %v1947_v13 }
  0x3a   :  { %543 = vmatpush.msra.mxu2 %v1961_v18  ;;  %563 = vmatpush.msra.mxu3 %v1951_v14 }
  0x3b   :  { %1576 = vmatmul.msk.f32.gmra.mxu0 %vm60_vm0, %v40_v8  ;;  %1584 = vmatmul.msk.f32.gmra.mxu1 %vm60_vm0, %v40_v8 }
  0x3c   :  { %1592 = vmatmul.msk.f32.gmra.mxu2 %vm60_vm0, %v40_v8  ;;  %1600 = vmatmul.msk.f32.gmra.mxu3 %vm60_vm0, %v40_v8  ;;  %v1878_v8 = vmov 0.0  }
  0x3d   :  { %504 = vmatpush.msra.mxu0 %v1956_v16  ;;  %524 = vmatpush.msra.mxu1 %v1958_v17 }
  0x3e   :  { %544 = vmatpush.msra.mxu2 %v1972_v21  ;;  %564 = vmatpush.msra.mxu3 %v1965_v19 }
  0x3f   :  { %505 = vmatpush.msra.mxu0 %v1976_v22  ;;  %525 = vmatpush.msra.mxu1 %v1978_v23 }
  0x40   :  { %545 = vmatpush.msra.mxu2 %v1986_v25  ;;  %565 = vmatpush.msra.mxu3 %v1984_v24 }
  0x41   :  { %506 = vmatpush.msra.mxu0 %v1990_v26  ;;  %526 = vmatpush.msra.mxu1 %v1992_v27 }
  0x42   :  { %546 = vmatpush.msra.mxu2 %v1998_v29  ;;  %566 = vmatpush.msra.mxu3 %v1996_v28 }
  0x43   :  { %1577 = vmatmul.msk.f32.gmra.mxu0 %vm60_vm0, %v41_v20  ;;  %1585 = vmatmul.msk.f32.gmra.mxu1 %vm60_vm0, %v41_v20 }
  0x44   :  { %1593 = vmatmul.msk.f32.gmra.mxu2 %vm60_vm0, %v41_v20  ;;  %1601 = vmatmul.msk.f32.gmra.mxu3 %vm60_vm0, %v41_v20  ;;  %v3008_v20 = vld [vmem:[#allocation25_spill] sm:$0xff] }
  0x45   :  { %507 = vmatpush.msra.mxu0 %v2001_v30  ;;  %527 = vmatpush.msra.mxu1 %v2003_v31 }
  0x46   :  { %547 = vmatpush.msra.mxu2 %v2010_v33  ;;  %567 = vmatpush.msra.mxu3 %v2008_v32 }
  0x47   :  { %508 = vmatpush.msra.mxu0 %v2019_v35  ;;  %528 = vmatpush.msra.mxu1 %v2021_v36 }
  0x48   :  { %548 = vmatpush.msra.mxu2 %v2029_v38  ;;  %568 = vmatpush.msra.mxu3 %v2027_v37 }
  0x49   :  { %509 = vmatpush.msra.mxu0 %v2033_v39  ;;  %529 = vmatpush.msra.mxu1 %v2035_v40 }
  0x4a   :  { %549 = vmatpush.msra.mxu2 %v2041_v42  ;;  %569 = vmatpush.msra.mxu3 %v2039_v41 }
  0x4b   :  { %368 = vmatmul.f32.vlgmr.msrb.gmra.mxu0 %v1878_v8  ;;  %388 = vmatmul.f32.vlgmr.msrb.gmra.mxu1 %v1878_v8 }
  0x4c   :  { %408 = vmatmul.f32.vlgmr.msrb.gmra.mxu2 %v1878_v8  ;;  %428 = vmatmul.f32.vlgmr.msrb.gmra.mxu3 %v1878_v8  ;;  %v3009_v8 = vld [vmem:[#allocation30_spill] sm:$0xff] }
  0x4d   :  { %510 = vmatpush.msra.mxu0 %v2044_v43  ;;  %530 = vmatpush.msra.mxu1 %v2046_v44 }
  0x4e   :  { %550 = vmatpush.msra.mxu2 %v2053_v46  ;;  %570 = vmatpush.msra.mxu3 %v2051_v45 }
  0x4f   :  { %511 = vmatpush.msra.mxu0 %v2062_v48  ;;  %531 = vmatpush.msra.mxu1 %v2064_v49 }
  0x50   :  { %551 = vmatpush.msra.mxu2 %v2072_v51  ;;  %571 = vmatpush.msra.mxu3 %v2070_v50 }
  0x51   :  { %512 = vmatpush.msra.mxu0 %v2076_v52  ;;  %532 = vmatpush.msra.mxu1 %v2078_v53 }
  0x52   :  { %552 = vmatpush.msra.mxu2 %v2084_v55  ;;  %572 = vmatpush.msra.mxu3 %v2082_v54 }
  0x53   :  { %513 = vmatpush.msra.mxu0 %v2087_v56  ;;  %533 = vmatpush.msra.mxu1 %v2089_v57 }
  0x54   :  { %553 = vmatpush.msra.mxu2 %v2096_v59  ;;  %573 = vmatpush.msra.mxu3 %v2094_v58 }
  0x55   :  { %514 = vmatpush.msra.mxu0 %v2105_v61  ;;  %534 = vmatpush.msra.mxu1 %v2107_v62 }
  0x56   :  { %554 = vmatpush.msra.mxu2 %v2115_v0  ;;  %574 = vmatpush.msra.mxu3 %v2113_v63 }
  0x57   :  { %515 = vmatpush.msra.mxu0 %v2119_v1  ;;  %535 = vmatpush.msra.mxu1 %v2121_v2 }
  0x58   :  { %555 = vmatpush.msra.mxu2 %v2127_v4  ;;  %575 = vmatpush.msra.mxu3 %v3008_v20 }
  0x59   :  { %516 = vmatpush.msra.mxu0 %v2130_v5  ;;  %536 = vmatpush.msra.mxu1 %v2132_v6 }
  0x5a   :  { %556 = vmatpush.msra.mxu2 %v2137_v7  ;;  %576 = vmatpush.msra.mxu3 %v3009_v8 }
  0x5b   :  { %517 = vmatpush.msra.mxu0 %v2148_v34  ;;  %537 = vmatpush.msra.mxu1 %v2150_v47 }
  0x5c   :  { %557 = vmatpush.msra.mxu2 %v2156_v60  ;;  %577 = vmatpush.msra.mxu3 %v2158_v3 }
  0x5d   :  { %652 = vmatpush.msrb.mxu0 %v1935_v9  ;;  %672 = vmatpush.msrb.mxu1 %v1937_v10 }
  0x5e   :  { %692 = vmatpush.msrb.mxu2 %v1953_v15  ;;  %712 = vmatpush.msrb.mxu3 %v1941_v11 }
  0x5f   :  { %653 = vmatpush.msrb.mxu0 %v1945_v12  ;;  %673 = vmatpush.msrb.mxu1 %v1947_v13 }
  0x60   :  { %693 = vmatpush.msrb.mxu2 %v1961_v18  ;;  %713 = vmatpush.msrb.mxu3 %v1951_v14 }
  0x61   :  { %654 = vmatpush.msrb.mxu0 %v1956_v16  ;;  %674 = vmatpush.msrb.mxu1 %v1958_v17 }
  0x62   :  { %694 = vmatpush.msrb.mxu2 %v1972_v21  ;;  %714 = vmatpush.msrb.mxu3 %v1965_v19 }
  0x63   :  { %655 = vmatpush.msrb.mxu0 %v1976_v22  ;;  %675 = vmatpush.msrb.mxu1 %v1978_v23 }
  0x64   :  { %695 = vmatpush.msrb.mxu2 %v1986_v25  ;;  %715 = vmatpush.msrb.mxu3 %v1984_v24 }
  0x65   :  { %656 = vmatpush.msrb.mxu0 %v1990_v26  ;;  %676 = vmatpush.msrb.mxu1 %v1992_v27 }
  0x66   :  { %696 = vmatpush.msrb.mxu2 %v1998_v29  ;;  %716 = vmatpush.msrb.mxu3 %v1996_v28 }
  0x67   :  { %657 = vmatpush.msrb.mxu0 %v2001_v30  ;;  %677 = vmatpush.msrb.mxu1 %v2003_v31 }
  0x68   :  { %697 = vmatpush.msrb.mxu2 %v2010_v33  ;;  %717 = vmatpush.msrb.mxu3 %v2008_v32 }
  0x69   :  { %658 = vmatpush.msrb.mxu0 %v2019_v35  ;;  %678 = vmatpush.msrb.mxu1 %v2021_v36 }
  0x6a   :  { %698 = vmatpush.msrb.mxu2 %v2029_v38  ;;  %718 = vmatpush.msrb.mxu3 %v2027_v37 }
  0x6b   :  { %659 = vmatpush.msrb.mxu0 %v2033_v39  ;;  %679 = vmatpush.msrb.mxu1 %v2035_v40 }
  0x6c   :  { %699 = vmatpush.msrb.mxu2 %v2041_v42  ;;  %719 = vmatpush.msrb.mxu3 %v2039_v41 }
  0x6d   :  { %660 = vmatpush.msrb.mxu0 %v2044_v43  ;;  %680 = vmatpush.msrb.mxu1 %v2046_v44 }
  0x6e   :  { %700 = vmatpush.msrb.mxu2 %v2053_v46  ;;  %720 = vmatpush.msrb.mxu3 %v2051_v45 }
  0x6f   :  { %661 = vmatpush.msrb.mxu0 %v2062_v48  ;;  %681 = vmatpush.msrb.mxu1 %v2064_v49 }
  0x70   :  { %701 = vmatpush.msrb.mxu2 %v2072_v51  ;;  %721 = vmatpush.msrb.mxu3 %v2070_v50 }
  0x71   :  { %662 = vmatpush.msrb.mxu0 %v2076_v52  ;;  %682 = vmatpush.msrb.mxu1 %v2078_v53 }
  0x72   :  { %702 = vmatpush.msrb.mxu2 %v2084_v55  ;;  %722 = vmatpush.msrb.mxu3 %v2082_v54 }
  0x73   :  { %663 = vmatpush.msrb.mxu0 %v2087_v56  ;;  %683 = vmatpush.msrb.mxu1 %v2089_v57 }
  0x74   :  { %703 = vmatpush.msrb.mxu2 %v2096_v59  ;;  %723 = vmatpush.msrb.mxu3 %v2094_v58 }
  0x75   :  { %664 = vmatpush.msrb.mxu0 %v2105_v61  ;;  %684 = vmatpush.msrb.mxu1 %v2107_v62 }
  0x76   :  { %704 = vmatpush.msrb.mxu2 %v2115_v0  ;;  %724 = vmatpush.msrb.mxu3 %v2113_v63 }
  0x77   :  { %665 = vmatpush.msrb.mxu0 %v2119_v1  ;;  %685 = vmatpush.msrb.mxu1 %v2121_v2 }
  0x78   :  { %705 = vmatpush.msrb.mxu2 %v2127_v4  ;;  %725 = vmatpush.msrb.mxu3 %v3008_v20 }
  0x79   :  { %666 = vmatpush.msrb.mxu0 %v2130_v5  ;;  %686 = vmatpush.msrb.mxu1 %v2132_v6  ;;  %v50_v5 = vld [vmem:[%s2893_s3] sm:$0xf]  ;;  %s1879_s3 = smov [#allocation6]  }
  0x7a   :  { %706 = vmatpush.msrb.mxu2 %v2137_v7  ;;  %726 = vmatpush.msrb.mxu3 %v3009_v8  ;;  %v52_v20 = vperm.slane %v50_v5, 0  ;;  %v53_v6 = vperm.slane %v50_v5, 1  ;;  %s1551_s27 = sshll.u32 %s1879_s3, 4  ;;  %s1552_s27 = int_to_ptr.vmem [resolvable:$true] %s1551_s27 }
  0x7b   :  { %667 = vmatpush.msrb.mxu0 %v2148_v34  ;;  %687 = vmatpush.msrb.mxu1 %v2150_v47 }
  0x7c   :  { %707 = vmatpush.msrb.mxu2 %v2156_v60  ;;  %727 = vmatpush.msrb.mxu3 %v2158_v3  ;;  %v2319_v60 = vperm.slane %v50_v5, 2  ;;  %v55_v3 = vperm.slane %v50_v5, 3 }
  0x88   :  { %v102_v2 = vpop.f32.mrf.mxu0  ;;  %v143_v4 = vpop.f32.mrf.mxu1 }
  0x8f   :  { %v2311_v1 = vpop.f32.mrf.mxu2  ;;  %v2313_v7 = vpop.f32.mrf.mxu3 }
  0x90   :  { %v105_v8 = vpop.f32.mrf.mxu0  ;;  %v146_v34 = vpop.f32.mrf.mxu1 }
  0x91   :  { %v2315_v63 = vadd.f32 %v105_v8, %v52_v20  ;;  %v2317_v47 = vadd.f32 %v146_v34, %v53_v6 }
  0x93   :  { %3010 = vst [vmem:[#allocation35_spill] sm:$0xff] %v2315_v63 }
  0x94   :  { %3011 = vst [vmem:[#allocation36_spill] sm:$0xff] %v2317_v47 }
  0x97   :  { %v187_v0 = vpop.f32.mrf.mxu2  ;;  %v228_v62 = vpop.f32.mrf.mxu3 }
  0x98   :  { %v2322_v61 = vadd.f32 %v187_v0, %v2319_v60  ;;  %v2324_v58 = vadd.f32 %v228_v62, %v55_v3  ;;  %v108_v59 = vpop.f32.mrf.mxu0  ;;  %v149_v57 = vpop.f32.mrf.mxu1 }
  0x99   :  { %v2326_v56 = vadd.f32 %v108_v59, %v52_v20  ;;  %v2328_v54 = vadd.f32 %v149_v57, %v53_v6 }
  0x9a   :  { %3012 = vst [vmem:[#allocation37_spill] sm:$0xff] %v2322_v61 }
  0x9b   :  { %3013 = vst [vmem:[#allocation38_spill] sm:$0xff] %v2324_v58 }
  0x9c   :  { %3014 = vst [vmem:[#allocation39_spill] sm:$0xff] %v2326_v56 }
  0x9d   :  { %3015 = vst [vmem:[#allocation40_spill] sm:$0xff] %v2328_v54 }
  0x9f   :  { %v190_v8 = vpop.f32.mrf.mxu2  ;;  %v231_v63 = vpop.f32.mrf.mxu3 }
  0xa0   :  { %v2331_v34 = vadd.f32 %v190_v8, %v2319_v60  ;;  %v2333_v47 = vadd.f32 %v231_v63, %v55_v3  ;;  %v111_v5 = vpop.f32.mrf.mxu0  ;;  %v152_v55 = vpop.f32.mrf.mxu1 }
  0xa1   :  { %v2335_v53 = vadd.f32 %v111_v5, %v52_v20  ;;  %v2337_v0 = vadd.f32 %v152_v55, %v53_v6 }
  0xa2   :  { %3016 = vst [vmem:[#allocation41_spill] sm:$0xff] %v2331_v34 }
  0xa3   :  { %3017 = vst [vmem:[#allocation42_spill] sm:$0xff] %v2333_v47 }
  0xa4   :  { %3018 = vst [vmem:[#allocation43_spill] sm:$0xff] %v2335_v53 }
  0xa5   :  { %3019 = vst [vmem:[#allocation44_spill] sm:$0xff] %v2337_v0 }
  0xa7   :  { %v193_v62 = vpop.f32.mrf.mxu2  ;;  %v234_v61 = vpop.f32.mrf.mxu3 }
  0xa8   :  { %v2340_v59 = vadd.f32 %v193_v62, %v2319_v60  ;;  %v2342_v57 = vadd.f32 %v234_v61, %v55_v3  ;;  %v114_v54 = vpop.f32.mrf.mxu0  ;;  %v155_v56 = vpop.f32.mrf.mxu1 }
  0xa9   :  { %v2344_v58 = vadd.f32 %v114_v54, %v52_v20  ;;  %v2346_v8 = vadd.f32 %v155_v56, %v53_v6 }
  0xaa   :  { %3020 = vst [vmem:[#allocation45_spill] sm:$0xff] %v2340_v59 }
  0xab   :  { %3021 = vst [vmem:[#allocation46_spill] sm:$0xff] %v2342_v57 }
  0xac   :  { %3022 = vst [vmem:[#allocation47_spill] sm:$0xff] %v2344_v58 }
  0xad   :  { %3023 = vst [vmem:[#allocation48_spill] sm:$0xff] %v2346_v8 }
  0xaf   :  { %v196_v63 = vpop.f32.mrf.mxu2  ;;  %v237_v34 = vpop.f32.mrf.mxu3 }
  0xb0   :  { %v2349_v5 = vadd.f32 %v196_v63, %v2319_v60  ;;  %v2351_v55 = vadd.f32 %v237_v34, %v55_v3  ;;  %v117_v0 = vpop.f32.mrf.mxu0  ;;  %v158_v53 = vpop.f32.mrf.mxu1 }
  0xb1   :  { %v2353_v47 = vadd.f32 %v117_v0, %v52_v20  ;;  %v2355_v62 = vadd.f32 %v158_v53, %v53_v6 }
  0xb2   :  { %3024 = vst [vmem:[#allocation49_spill] sm:$0xff] %v2349_v5 }
  0xb3   :  { %3025 = vst [vmem:[#allocation50_spill] sm:$0xff] %v2351_v55 }
  0xb4   :  { %3026 = vst [vmem:[#allocation51_spill] sm:$0xff] %v2353_v47 }
  0xb5   :  { %3027 = vst [vmem:[#allocation52_spill] sm:$0xff] %v2355_v62 }
  0xb7   :  { %v199_v61 = vpop.f32.mrf.mxu2  ;;  %v240_v59 = vpop.f32.mrf.mxu3 }
  0xb8   :  { %v2358_v54 = vadd.f32 %v199_v61, %v2319_v60  ;;  %v2360_v56 = vadd.f32 %v240_v59, %v55_v3  ;;  %v120_v8 = vpop.f32.mrf.mxu0  ;;  %v161_v58 = vpop.f32.mrf.mxu1  ;;  %v103_v59 = vadd.f32 %v102_v2, %v52_v20 }
  0xb9   :  { %v2362_v57 = vadd.f32 %v120_v8, %v52_v20  ;;  %v2364_v63 = vadd.f32 %v161_v58, %v53_v6 }
  0xba   :  { %3028 = vst [vmem:[#allocation53_spill] sm:$0xff] %v2358_v54  ;;  %v144_v54 = vadd.f32 %v143_v4, %v53_v6 }
  0xbb   :  { %3029 = vst [vmem:[#allocation54_spill] sm:$0xff] %v2360_v56 }
  0xbc   :  { %3030 = vst [vmem:[#allocation55_spill] sm:$0xff] %v2362_v57 }
  0xbd   :  { %3031 = vst [vmem:[#allocation56_spill] sm:$0xff] %v2364_v63 }
  0xbf   :  { %v202_v34 = vpop.f32.mrf.mxu2  ;;  %v243_v5 = vpop.f32.mrf.mxu3 }
  0xc0   :  { %v2367_v0 = vadd.f32 %v202_v34, %v2319_v60  ;;  %v2369_v53 = vadd.f32 %v243_v5, %v55_v3  ;;  %v123_v62 = vpop.f32.mrf.mxu0  ;;  %v164_v47 = vpop.f32.mrf.mxu1 }
  0xc1   :  { %v2371_v55 = vadd.f32 %v123_v62, %v52_v20  ;;  %v2373_v61 = vadd.f32 %v164_v47, %v53_v6  ;;  %v226_v62 = vadd.f32 %v2313_v7, %v55_v3 }
  0xc2   :  { %3032 = vst [vmem:[#allocation57_spill] sm:$0xff] %v2367_v0 }
  0xc3   :  { %3033 = vst [vmem:[#allocation58_spill] sm:$0xff] %v2369_v53 }
  0xc4   :  { %3034 = vst [vmem:[#allocation59_spill] sm:$0xff] %v2371_v55 }
  0xc5   :  { %3035 = vst [vmem:[#allocation60_spill] sm:$0xff] %v2373_v61 }
  0xc7   :  { %v205_v56 = vpop.f32.mrf.mxu2  ;;  %v246_v8 = vpop.f32.mrf.mxu3 }
  0xc8   :  { %v2376_v58 = vadd.f32 %v205_v56, %v2319_v60  ;;  %v2378_v63 = vadd.f32 %v246_v8, %v55_v3  ;;  %v369_v57 = vpop.f32.mrf.mxu0  ;;  %v389_v34 = vpop.f32.mrf.mxu1 }
  0xc9   :  { %v370_v0 = vadd.f32 %v369_v57, %v103_v59  ;;  %v390_v5 = vadd.f32 %v389_v34, %v144_v54  ;;  %v185_v57 = vadd.f32 %v2311_v1, %v2319_v60 }
  0xca   :  { %3036 = vst [vmem:[#allocation61_spill] sm:$0xff] %v2376_v58 }
  0xcb   :  { %3037 = vst [vmem:[#allocation62_spill] sm:$0xff] %v2378_v63  ;;  %v1602_v53 = vmul.f32 -1.442695, %v370_v0  ;;  %v1603_v52 = vmul.f32 -1.442695, %v390_v5 }
  0xcd   :  { %1631 = vpow2.f32 %v1602_v53 }
  0xce   :  { %1633 = vpow2.f32 %v1603_v52 }
  0xcf   :  { %v429_v47 = vpop.f32.mrf.mxu3  ;;  %v409_v8 = vpop.f32.mrf.mxu2 }
  0xd0   :  { %v430_v2 = vadd.f32 %v429_v47, %v226_v62  ;;  %v410_v53 = vadd.f32 %v409_v8, %v185_v57 }
  0xd2   :  { %v1604_v4 = vmul.f32 -1.442695, %v430_v2 }
  0xd3   :  { %v1632_v6 = vpop.eup %1631 }
  0xd4   :  { %v1634_v20 = vpop.eup %1633  ;;  %v435_v61 = vadd.f32 1.0, %v1632_v6  ;;  %1635 = vpow2.f32 %v1604_v4 }
  0xd5   :  { %v454_v56 = vadd.f32 1.0, %v1634_v20 }
  0xd6   :  { %1637 = vrcp.f32 %v435_v61  ;;  %v447_v5 = vand.u32 2147483648, %v435_v61  ;;  %v445_v2 = vand.u32 2147483647, %v435_v61  ;;  %vm441_vm3 = vweird.f32 %v435_v61 }
  0xd7   :  { %1639 = vrcp.f32 %v454_v56  ;;  %v466_v62 = vand.u32 2147483648, %v454_v56  ;;  %v464_v6 = vand.u32 2147483647, %v454_v56  ;;  %vm460_vm4 = vweird.f32 %v454_v56 }
  0xd8   :  { %v448_v60 = vor.u32 1.1754944e-38, %v447_v5  ;;  %vm446_vm6 = vcmp.eq.f32.partialorder %v445_v2, 8.507059e+37 }
  0xd9   :  { %v467_v57 = vor.u32 1.1754944e-38, %v466_v62  ;;  %vm465_vm8 = vcmp.eq.f32.partialorder %v464_v6, 8.507059e+37 }
  0xda   :  { %v1636_v58 = vpop.eup %1635 }
  0xdb   :  { %v474_v54 = vadd.f32 1.0, %v1636_v58 }
  0xdc   :  { %v1638_v0 = vpop.eup %1637 }
  0xdd   :  { %v1640_v3 = vpop.eup %1639  ;;  %v437_v52 = vmul.f32 %v1638_v0, %v435_v61  ;;  %1641 = vrcp.f32 %v474_v54  ;;  %vm442_vm1 = vweird.f32 %v1638_v0  ;;  %vm480_vm10 = vweird.f32 %v474_v54 }
  0xde   :  { %v456_v7 = vmul.f32 %v1640_v3, %v454_v56  ;;  %1643 = vtanh.f32 %v410_v53  ;;  %vm461_vm2 = vweird.f32 %v1640_v3  ;;  %vm443_vm5 = vmor %vm441_vm3, %vm442_vm1  ;;  %v486_v56 = vand.u32 2147483648, %v474_v54 }
  0xdf   :  { %v438_v59 = vsub.f32 1.0, %v437_v52  ;;  %vm462_vm7 = vmor %vm460_vm4, %vm461_vm2 }
  0xe0   :  { %v457_v34 = vsub.f32 1.0, %v456_v7  ;;  %v487_v62 = vor.u32 1.1754944e-38, %v486_v56 }
  0xe1   :  { %v439_v47 = vmul.f32 %v1638_v0, %v438_v59 }
  0xe2   :  { %v458_v4 = vmul.f32 %v1640_v3, %v457_v34 }
  0xe3   :  { %v1642_v20 = vpop.eup %1641  ;;  %v440_v1 = vadd.f32 %v1638_v0, %v439_v47 }
  0xe4   :  { %v459_v58 = vadd.f32 %v1640_v3, %v458_v4  ;;  %v476_v8 = vmul.f32 %v1642_v20, %v474_v54  ;;  %v1644_v53 = vpop.eup %1643  ;;  %vm481_vm9 = vweird.f32 %v1642_v20 }
  0xe5   :  { %v444_v52 = vsel %vm443_vm5, %v1638_v0, %v440_v1  ;;  %v484_v0 = vand.u32 2147483647, %v474_v54  ;;  %vm482_vm11 = vmor %vm480_vm10, %vm481_vm9 }
  0xe6   :  { %v449_v7 = vsel %vm446_vm6, %v448_v60, %v444_v52  ;;  %v463_v59 = vsel %vm462_vm7, %v1640_v3, %v459_v58  ;;  %v477_v63 = vsub.f32 1.0, %v476_v8  ;;  %v3067_v60 = vld [vmem:[#allocation37_spill] sm:$0xff] }
  0xe7   :  { %v468_v34 = vsel %vm465_vm8, %v467_v57, %v463_v59  ;;  %v491_v55 = vmul.f32 %v1644_v53, %v449_v7  ;;  %vm485_vm12 = vcmp.eq.f32.partialorder %v484_v0, 8.507059e+37 }
  0xe8   :  { %v490_v50 = vmul.f32 0.0, %v468_v34  ;;  %v478_v51 = vmul.f32 %v1642_v20, %v477_v63 }
  0xea   :  { %v2383_v47 = vadd.f32 %v491_v55, %v490_v50  ;;  %v479_v61 = vadd.f32 %v1642_v20, %v478_v51 }
  0xec   :  { %1645 = vtanh.f32 %v2383_v47  ;;  %v483_v5 = vsel %vm482_vm11, %v1642_v20, %v479_v61 }
  0xed   :  { %v488_v2 = vsel %vm485_vm12, %v487_v62, %v483_v5 }
  0xf2   :  { %v1646_v3 = vpop.eup %1645 }
  0xf3   :  { %v494_v4 = vmul.f32 %v1646_v3, %v488_v2 }
  0xf5   :  { %518 = vmatmul.f32.vlgmr.msra.gmra.mxu0 %v494_v4  ;;  %538 = vmatmul.f32.vlgmr.msra.gmra.mxu1 %v494_v4 }
  0xf6   :  { %558 = vmatmul.f32.vlgmr.msra.gmra.mxu2 %v494_v4  ;;  %578 = vmatmul.f32.vlgmr.msra.gmra.mxu3 %v494_v4 }
  0xf7   :  { %802 = vmatpush.msra.mxu0 %v1935_v9  ;;  %822 = vmatpush.msra.mxu1 %v1937_v10  ;;  %v3038_v9 = vld [vmem:[#allocation10_spill] sm:$0xff]  ;;  %v3039_v10 = vld [vmem:[#allocation9_spill] sm:$0xff] }
  0xf8   :  { %842 = vmatpush.msra.mxu2 %v1953_v15  ;;  %862 = vmatpush.msra.mxu3 %v1941_v11  ;;  %v3040_v11 = vld [vmem:[#allocation11_spill] sm:$0xff] }
  0xf9   :  { %803 = vmatpush.msra.mxu0 %v1945_v12  ;;  %823 = vmatpush.msra.mxu1 %v1947_v13  ;;  %v3041_v12 = vld [vmem:[#allocation12_spill] sm:$0xff]  ;;  %v3042_v13 = vld [vmem:[#allocation14_spill] sm:$0xff]  ;;  %v3044_v15 = vld [vmem:[#allocation15_spill] sm:$0xff] }
  0xfa   :  { %843 = vmatpush.msra.mxu2 %v1961_v18  ;;  %863 = vmatpush.msra.mxu3 %v1951_v14  ;;  %v3043_v14 = vld [vmem:[#allocation13_spill] sm:$0xff] }
  0xfb   :  { %804 = vmatpush.msra.mxu0 %v1956_v16  ;;  %824 = vmatpush.msra.mxu1 %v1958_v17  ;;  %v3045_v16 = vld [vmem:[#allocation16_spill] sm:$0xff]  ;;  %v3046_v17 = vld [vmem:[#allocation18_spill] sm:$0xff]  ;;  %v3047_v18 = vld [vmem:[#allocation17_spill] sm:$0xff] }
  0xfc   :  { %844 = vmatpush.msra.mxu2 %v1972_v21  ;;  %864 = vmatpush.msra.mxu3 %v1965_v19  ;;  %v3048_v19 = vld [vmem:[#allocation19_spill] sm:$0xff]  ;;  %v3049_v21 = vld [vmem:[#allocation20_spill] sm:$0xff] }
  0xfd   :  { %805 = vmatpush.msra.mxu0 %v1976_v22  ;;  %825 = vmatpush.msra.mxu1 %v1978_v23  ;;  %v3050_v22 = vld [vmem:[#allocation22_spill] sm:$0xff]  ;;  %v3051_v23 = vld [vmem:[#allocation21_spill] sm:$0xff] }
  0xfe   :  { %845 = vmatpush.msra.mxu2 %v1986_v25  ;;  %865 = vmatpush.msra.mxu3 %v1984_v24  ;;  %v3052_v24 = vld [vmem:[#allocation23_spill] sm:$0xff]  ;;  %v3053_v25 = vld [vmem:[#allocation24_spill] sm:$0xff] }
  0xff   :  { %806 = vmatpush.msra.mxu0 %v1990_v26  ;;  %826 = vmatpush.msra.mxu1 %v1992_v27  ;;  %v3054_v26 = vld [vmem:[#allocation26_spill] sm:$0xff]  ;;  %v3055_v27 = vld [vmem:[#allocation25_spill] sm:$0xff] }
 0x100   :  { %846 = vmatpush.msra.mxu2 %v1998_v29  ;;  %866 = vmatpush.msra.mxu3 %v1996_v28  ;;  %v3056_v28 = vld [vmem:[#allocation27_spill] sm:$0xff]  ;;  %v3057_v29 = vld [vmem:[#allocation28_spill] sm:$0xff] }
 0x101   :  { %807 = vmatpush.msra.mxu0 %v2001_v30  ;;  %827 = vmatpush.msra.mxu1 %v2003_v31  ;;  %v3058_v30 = vld [vmem:[#allocation29_spill] sm:$0xff]  ;;  %v3059_v31 = vld [vmem:[#allocation30_spill] sm:$0xff] }
 0x102   :  { %847 = vmatpush.msra.mxu2 %v2010_v33  ;;  %867 = vmatpush.msra.mxu3 %v2008_v32  ;;  %v3060_v32 = vld [vmem:[#allocation31_spill] sm:$0xff]  ;;  %v3061_v33 = vld [vmem:[#allocation32_spill] sm:$0xff] }
 0x103   :  { %808 = vmatpush.msra.mxu0 %v2019_v35  ;;  %828 = vmatpush.msra.mxu1 %v2021_v36  ;;  %v3062_v35 = vld [vmem:[#allocation33_spill] sm:$0xff]  ;;  %v3063_v36 = vld [vmem:[#allocation34_spill] sm:$0xff] }
 0x104   :  { %848 = vmatpush.msra.mxu2 %v2029_v38  ;;  %868 = vmatpush.msra.mxu3 %v2027_v37 }
 0x105   :  { %809 = vmatpush.msra.mxu0 %v2033_v39  ;;  %829 = vmatpush.msra.mxu1 %v2035_v40  ;;  %v3064_v39 = vld [vmem:[#allocation35_spill] sm:$0xff] }
 0x106   :  { %849 = vmatpush.msra.mxu2 %v2041_v42  ;;  %869 = vmatpush.msra.mxu3 %v2039_v41  ;;  %v3065_v41 = vld [vmem:[#allocation36_spill] sm:$0xff] }
 0x107   :  { %810 = vmatpush.msra.mxu0 %v2044_v43  ;;  %830 = vmatpush.msra.mxu1 %v2046_v44 }
 0x108   :  { %850 = vmatpush.msra.mxu2 %v2053_v46  ;;  %870 = vmatpush.msra.mxu3 %v2051_v45  ;;  %v3066_v46 = vld [vmem:[#allocation38_spill] sm:$0xff] }
 0x109   :  { %811 = vmatpush.msra.mxu0 %v2062_v48  ;;  %831 = vmatpush.msra.mxu1 %v2064_v49 }
 0x10a   :  { %851 = vmatpush.msra.mxu2 %v3038_v9  ;;  %871 = vmatpush.msra.mxu3 %v3039_v10 }
 0x10b   :  { %812 = vmatpush.msra.mxu0 %v3040_v11  ;;  %832 = vmatpush.msra.mxu1 %v3041_v12 }
 0x10c   :  { %852 = vmatpush.msra.mxu2 %v3042_v13  ;;  %872 = vmatpush.msra.mxu3 %v3043_v14 }
 0x10d   :  { %813 = vmatpush.msra.mxu0 %v3044_v15  ;;  %833 = vmatpush.msra.mxu1 %v3045_v16 }
 0x10e   :  { %853 = vmatpush.msra.mxu2 %v3046_v17  ;;  %873 = vmatpush.msra.mxu3 %v3047_v18 }
 0x10f   :  { %814 = vmatpush.msra.mxu0 %v3048_v19  ;;  %834 = vmatpush.msra.mxu1 %v3049_v21 }
 0x110   :  { %854 = vmatpush.msra.mxu2 %v3050_v22  ;;  %874 = vmatpush.msra.mxu3 %v3051_v23 }
 0x111   :  { %815 = vmatpush.msra.mxu0 %v3052_v24  ;;  %835 = vmatpush.msra.mxu1 %v3053_v25 }
 0x112   :  { %855 = vmatpush.msra.mxu2 %v3054_v26  ;;  %875 = vmatpush.msra.mxu3 %v3055_v27 }
 0x113   :  { %816 = vmatpush.msra.mxu0 %v3056_v28  ;;  %836 = vmatpush.msra.mxu1 %v3057_v29 }
 0x114   :  { %856 = vmatpush.msra.mxu2 %v3058_v30  ;;  %876 = vmatpush.msra.mxu3 %v3059_v31 }
 0x115   :  { %817 = vmatpush.msra.mxu0 %v3060_v32  ;;  %837 = vmatpush.msra.mxu1 %v3061_v33 }
 0x116   :  { %857 = vmatpush.msra.mxu2 %v3062_v35  ;;  %877 = vmatpush.msra.mxu3 %v3063_v36 }
 0x172   :  { %v519_v37 = vpop.f32.mrf.mxu0  ;;  %v539_v38 = vpop.f32.mrf.mxu1 }
 0x173   :  { %v520_v40 = vadd.f32 %v519_v37, %v3064_v39  ;;  %v540_v42 = vadd.f32 %v539_v38, %v3065_v41  ;;  %v2461_v37 = vld [vmem:[#allocation3 + $0x1e8] sm:$0xff]  ;;  %v2464_v38 = vld [vmem:[#allocation3 + $0x1f0] sm:$0xff]  ;;  %v2467_v39 = vld [vmem:[#allocation3 + $0x1f8] sm:$0xff] }
 0x174   :  { %v2473_v41 = vld [vmem:[#allocation3 + $0x1c8] sm:$0xff] }
 0x175   :  { %v1605_v43 = vmul.f32 -1.442695, %v520_v40  ;;  %v1606_v44 = vmul.f32 -1.442695, %v540_v42  ;;  %v2470_v40 = vld [vmem:[#allocation3 + $0x1c0] sm:$0xff]  ;;  %v2476_v42 = vld [vmem:[#allocation3 + $0x1d0] sm:$0xff] }
 0x177   :  { %1647 = vpow2.f32 %v1605_v43  ;;  %v2479_v43 = vld [vmem:[#allocation3 + $0x1d8] sm:$0xff] }
 0x178   :  { %1649 = vpow2.f32 %v1606_v44  ;;  %v2482_v44 = vld [vmem:[#allocation3 + $0x1a0] sm:$0xff] }
 0x179   :  { %v579_v45 = vpop.f32.mrf.mxu3  ;;  %v559_v54 = vpop.f32.mrf.mxu2 }
 0x17a   :  { %v580_v48 = vadd.f32 %v579_v45, %v3066_v46  ;;  %v560_v58 = vadd.f32 %v559_v54, %v3067_v60  ;;  %v2485_v45 = vld [vmem:[#allocation3 + $0x1a8] sm:$0xff]  ;;  %v2488_v46 = vld [vmem:[#allocation3 + $0x1b0] sm:$0xff] }
 0x17b   :  { %v2509_v54 = vld [vmem:[#allocation3 + $0x168] sm:$0xff] }
 0x17c   :  { %v1607_v49 = vmul.f32 -1.442695, %v580_v48  ;;  %v2491_v48 = vld [vmem:[#allocation3 + $0x1b8] sm:$0xff]  ;;  %v2521_v60 = vld [vmem:[#allocation3 + $0x148] sm:$0xff] }
 0x17d   :  { %v1648_v50 = vpop.eup %1647 }
 0x17e   :  { %v1650_v51 = vpop.eup %1649  ;;  %v585_v55 = vadd.f32 1.0, %v1648_v50  ;;  %1651 = vpow2.f32 %v1607_v49  ;;  %v2494_v49 = vld [vmem:[#allocation3 + $0x180] sm:$0xff]  ;;  %v2497_v50 = vld [vmem:[#allocation3 + $0x188] sm:$0xff] }
 0x17f   :  { %v604_v63 = vadd.f32 1.0, %v1650_v51  ;;  %v2500_v51 = vld [vmem:[#allocation3 + $0x190] sm:$0xff] }
 0x180   :  { %1653 = vrcp.f32 %v585_v55  ;;  %v597_v59 = vand.u32 2147483648, %v585_v55  ;;  %v595_v56 = vand.u32 2147483647, %v585_v55  ;;  %vm591_vm15 = vweird.f32 %v585_v55 }
 0x181   :  { %1655 = vrcp.f32 %v604_v63  ;;  %v616_v34 = vand.u32 2147483648, %v604_v63  ;;  %v614_v5 = vand.u32 2147483647, %v604_v63  ;;  %vm610_vm0 = vweird.f32 %v604_v63 }
 0x182   :  { %v598_v2 = vor.u32 1.1754944e-38, %v597_v59  ;;  %vm596_vm3 = vcmp.eq.f32.partialorder %v595_v56, 8.507059e+37  ;;  %v2542_v59 = vld [vmem:[#allocation3 + $0x100] sm:$0xff]  ;;  %v2551_v56 = vld [vmem:[#allocation3 + $0x118] sm:$0xff] }
 0x183   :  { %v617_v10 = vor.u32 1.1754944e-38, %v616_v34  ;;  %vm615_vm4 = vcmp.eq.f32.partialorder %v614_v5, 8.507059e+37  ;;  %v2545_v34 = vld [vmem:[#allocation3 + $0x108] sm:$0xff] }
 0x184   :  { %v1652_v6 = vpop.eup %1651  ;;  %v2557_v5 = vld [vmem:[#allocation3 + $0xe8] sm:$0xff] }
 0x185   :  { %v624_v20 = vadd.f32 1.0, %v1652_v6  ;;  %v2512_v6 = vld [vmem:[#allocation3 + $0x170] sm:$0xff] }
 0x186   :  { %v1654_v1 = vpop.eup %1653 }
 0x187   :  { %v1656_v8 = vpop.eup %1655  ;;  %v587_v57 = vmul.f32 %v1654_v1, %v585_v55  ;;  %1657 = vrcp.f32 %v624_v20  ;;  %vm592_vm13 = vweird.f32 %v1654_v1  ;;  %v636_v23 = vand.u32 2147483648, %v624_v20  ;;  %v2503_v55 = vld [vmem:[#allocation3 + $0x198] sm:$0xff] }
 0x188   :  { %v606_v52 = vmul.f32 %v1656_v8, %v604_v63  ;;  %1659 = vtanh.f32 %v560_v58  ;;  %vm611_vm14 = vweird.f32 %v1656_v8  ;;  %vm593_vm1 = vmor %vm591_vm15, %vm592_vm13  ;;  %vm630_vm6 = vweird.f32 %v624_v20  ;;  %v2506_v63 = vld [vmem:[#allocation3 + $0x160] sm:$0xff]  ;;  %v2524_v58 = vld [vmem:[#allocation3 + $0x150] sm:$0xff] }
 0x189   :  { %v588_v53 = vsub.f32 1.0, %v587_v57  ;;  %vm612_vm2 = vmor %vm610_vm0, %vm611_vm14  ;;  %v634_v24 = vand.u32 2147483647, %v624_v20  ;;  %v637_v26 = vor.u32 1.1754944e-38, %v636_v23  ;;  %v2530_v57 = vld [vmem:[#allocation3 + $0x120] sm:$0xff]  ;;  %v2608_v23 = vld [vmem:[#allocation3 + $0x70] sm:$0xff] }
 0x18a   :  { %v607_v7 = vsub.f32 1.0, %v606_v52  ;;  %v2533_v52 = vld [vmem:[#allocation3 + $0x128] sm:$0xff]  ;;  %3080 = vst [vmem:[#allocation22_spill] sm:$0xff] %v2608_v23 }
 0x18b   :  { %v589_v61 = vmul.f32 %v1654_v1, %v588_v53  ;;  %vm635_vm8 = vcmp.eq.f32.partialorder %v634_v24, 8.507059e+37  ;;  %v2536_v53 = vld [vmem:[#allocation3 + $0x130] sm:$0xff]  ;;  %v2611_v24 = vld [vmem:[#allocation3 + $0x78] sm:$0xff] }
 0x18c   :  { %v608_v0 = vmul.f32 %v1656_v8, %v607_v7  ;;  %v2539_v7 = vld [vmem:[#allocation3 + $0x138] sm:$0xff]  ;;  %3081 = vst [vmem:[#allocation21_spill] sm:$0xff] %v2611_v24 }
 0x18d   :  { %v1658_v62 = vpop.eup %1657  ;;  %v590_v3 = vadd.f32 %v1654_v1, %v589_v61  ;;  %v2548_v61 = vld [vmem:[#allocation3 + $0x110] sm:$0xff] }
 0x18e   :  { %v609_v4 = vadd.f32 %v1656_v8, %v608_v0  ;;  %v626_v9 = vmul.f32 %v1658_v62, %v624_v20  ;;  %v1660_v12 = vpop.eup %1659  ;;  %vm631_vm5 = vweird.f32 %v1658_v62  ;;  %v2515_v20 = vld [vmem:[#allocation3 + $0x178] sm:$0xff]  ;;  %v2554_v0 = vld [vmem:[#allocation3 + $0xe0] sm:$0xff] }
 0x18f   :  { %v594_v11 = vsel %vm593_vm1, %v1654_v1, %v590_v3  ;;  %vm632_vm7 = vmor %vm630_vm6, %vm631_vm5  ;;  %v2518_v1 = vld [vmem:[#allocation3 + $0x140] sm:$0xff]  ;;  %v2563_v3 = vld [vmem:[#allocation3 + $0xf8] sm:$0xff] }
 0x190   :  { %v599_v13 = vsel %vm596_vm3, %v598_v2, %v594_v11  ;;  %v613_v14 = vsel %vm612_vm2, %v1656_v8, %v609_v4  ;;  %v627_v15 = vsub.f32 1.0, %v626_v9  ;;  %v2527_v8 = vld [vmem:[#allocation3 + $0x158] sm:$0xff]  ;;  %v2566_v2 = vld [vmem:[#allocation3 + $0xc0] sm:$0xff]  ;;  %v2569_v4 = vld [vmem:[#allocation3 + $0xc8] sm:$0xff] }
 0x191   :  { %v618_v16 = vsel %vm615_vm4, %v617_v10, %v613_v14  ;;  %v641_v17 = vmul.f32 %v1660_v12, %v599_v13  ;;  %v2572_v9 = vld [vmem:[#allocation3 + $0xd0] sm:$0xff]  ;;  %v2575_v10 = vld [vmem:[#allocation3 + $0xd8] sm:$0xff]  ;;  %v2578_v11 = vld [vmem:[#allocation3 + $0xa0] sm:$0xff] }
 0x192   :  { %v640_v18 = vmul.f32 %v618_v16, %v2383_v47  ;;  %v628_v19 = vmul.f32 %v1658_v62, %v627_v15  ;;  %v2458_v47 = vld [vmem:[#allocation3 + $0x1e0] sm:$0xff]  ;;  %3068 = vst [vmem:[#allocation10_spill] sm:$0xff] %v2572_v9  ;;  %v2581_v12 = vld [vmem:[#allocation3 + $0xa8] sm:$0xff]  ;;  %v2584_v13 = vld [vmem:[#allocation3 + $0xb0] sm:$0xff] }
 0x193   :  { %3069 = vst [vmem:[#allocation9_spill] sm:$0xff] %v2575_v10  ;;  %v2587_v14 = vld [vmem:[#allocation3 + $0xb8] sm:$0xff]  ;;  %v2590_v15 = vld [vmem:[#allocation3 + $0x80] sm:$0xff]  ;;  %v2593_v16 = vld [vmem:[#allocation3 + $0x88] sm:$0xff] }
 0x194   :  { %v2455_v21 = vadd.f32 %v641_v17, %v640_v18  ;;  %v629_v22 = vadd.f32 %v1658_v62, %v628_v19  ;;  %3070 = vst [vmem:[#allocation11_spill] sm:$0xff] %v2578_v11  ;;  %v2596_v17 = vld [vmem:[#allocation3 + $0x90] sm:$0xff]  ;;  %v2599_v18 = vld [vmem:[#allocation3 + $0x98] sm:$0xff]  ;;  %v2602_v19 = vld [vmem:[#allocation3 + $0x60] sm:$0xff] }
 0x195   :  { %3071 = vst [vmem:[#allocation12_spill] sm:$0xff] %v2581_v12 }
 0x196   :  { %1661 = vtanh.f32 %v2455_v21  ;;  %v633_v25 = vsel %vm632_vm7, %v1658_v62, %v629_v22  ;;  %v2560_v62 = vld [vmem:[#allocation3 + $0xf0] sm:$0xff]  ;;  %3072 = vst [vmem:[#allocation14_spill] sm:$0xff] %v2584_v13  ;;  %v2605_v22 = vld [vmem:[#allocation3 + $0x68] sm:$0xff] }
 0x197   :  { %v638_v28 = vsel %vm635_vm8, %v637_v26, %v633_v25  ;;  %3073 = vst [vmem:[#allocation13_spill] sm:$0xff] %v2587_v14  ;;  %v2614_v25 = vld [vmem:[#allocation3 + $0x40] sm:$0xff]  ;;  %v2617_v26 = vld [vmem:[#allocation3 + $0x48] sm:$0xff] }
 0x198   :  { %3074 = vst [vmem:[#allocation15_spill] sm:$0xff] %v2590_v15 }
 0x199   :  { %3075 = vst [vmem:[#allocation16_spill] sm:$0xff] %v2593_v16 }
 0x19a   :  { %3076 = vst [vmem:[#allocation18_spill] sm:$0xff] %v2596_v17 }
 0x19b   :  { %3077 = vst [vmem:[#allocation17_spill] sm:$0xff] %v2599_v18 }
 0x19c   :  { %v1662_v27 = vpop.eup %1661  ;;  %3078 = vst [vmem:[#allocation19_spill] sm:$0xff] %v2602_v19 }
 0x19d   :  { %v644_v29 = vmul.f32 %v1662_v27, %v638_v28  ;;  %3079 = vst [vmem:[#allocation20_spill] sm:$0xff] %v2605_v22  ;;  %v2620_v27 = vld [vmem:[#allocation3 + $0x50] sm:$0xff]  ;;  %v2623_v28 = vld [vmem:[#allocation3 + $0x58] sm:$0xff] }
 0x19e   :  { %3082 = vst [vmem:[#allocation23_spill] sm:$0xff] %v2614_v25 }
 0x19f   :  { %668 = vmatmul.f32.vlgmr.msrb.gmra.mxu0 %v644_v29  ;;  %688 = vmatmul.f32.vlgmr.msrb.gmra.mxu1 %v644_v29  ;;  %3083 = vst [vmem:[#allocation24_spill] sm:$0xff] %v2617_v26 }
 0x1a0   :  { %708 = vmatmul.f32.vlgmr.msrb.gmra.mxu2 %v644_v29  ;;  %728 = vmatmul.f32.vlgmr.msrb.gmra.mxu3 %v644_v29  ;;  %3084 = vst [vmem:[#allocation26_spill] sm:$0xff] %v2620_v27  ;;  %v2626_v29 = vld [vmem:[#allocation3 + $0x20] sm:$0xff] }
 0x1a1   :  { %952 = vmatpush.msrb.mxu0 %v2458_v47  ;;  %972 = vmatpush.msrb.mxu1 %v2461_v37  ;;  %3085 = vst [vmem:[#allocation25_spill] sm:$0xff] %v2623_v28 }
 0x1a2   :  { %992 = vmatpush.msrb.mxu2 %v2464_v38  ;;  %1012 = vmatpush.msrb.mxu3 %v2467_v39  ;;  %3086 = vst [vmem:[#allocation27_spill] sm:$0xff] %v2626_v29 }
 0x1a3   :  { %953 = vmatpush.msrb.mxu0 %v2470_v40  ;;  %973 = vmatpush.msrb.mxu1 %v2473_v41 }
 0x1a4   :  { %993 = vmatpush.msrb.mxu2 %v2476_v42  ;;  %1013 = vmatpush.msrb.mxu3 %v2479_v43 }
 0x1a5   :  { %954 = vmatpush.msrb.mxu0 %v2482_v44  ;;  %974 = vmatpush.msrb.mxu1 %v2485_v45 }
 0x1a6   :  { %994 = vmatpush.msrb.mxu2 %v2488_v46  ;;  %1014 = vmatpush.msrb.mxu3 %v2491_v48 }
 0x1a7   :  { %955 = vmatpush.msrb.mxu0 %v2494_v49  ;;  %975 = vmatpush.msrb.mxu1 %v2497_v50 }
 0x1a8   :  { %995 = vmatpush.msrb.mxu2 %v2500_v51  ;;  %1015 = vmatpush.msrb.mxu3 %v2503_v55 }
 0x1a9   :  { %956 = vmatpush.msrb.mxu0 %v2506_v63  ;;  %976 = vmatpush.msrb.mxu1 %v2509_v54 }
 0x1aa   :  { %996 = vmatpush.msrb.mxu2 %v2512_v6  ;;  %1016 = vmatpush.msrb.mxu3 %v2515_v20 }
 0x1ab   :  { %957 = vmatpush.msrb.mxu0 %v2518_v1  ;;  %977 = vmatpush.msrb.mxu1 %v2521_v60 }
 0x1ac   :  { %997 = vmatpush.msrb.mxu2 %v2524_v58  ;;  %1017 = vmatpush.msrb.mxu3 %v2527_v8 }
 0x1ad   :  { %958 = vmatpush.msrb.mxu0 %v2530_v57  ;;  %978 = vmatpush.msrb.mxu1 %v2533_v52 }
 0x1ae   :  { %998 = vmatpush.msrb.mxu2 %v2536_v53  ;;  %1018 = vmatpush.msrb.mxu3 %v2539_v7 }
 0x1af   :  { %959 = vmatpush.msrb.mxu0 %v2542_v59  ;;  %979 = vmatpush.msrb.mxu1 %v2545_v34 }
 0x1b0   :  { %999 = vmatpush.msrb.mxu2 %v2548_v61  ;;  %1019 = vmatpush.msrb.mxu3 %v2551_v56 }
 0x1b1   :  { %960 = vmatpush.msrb.mxu0 %v2554_v0  ;;  %980 = vmatpush.msrb.mxu1 %v2557_v5 }
 0x1b2   :  { %1000 = vmatpush.msrb.mxu2 %v2560_v62  ;;  %1020 = vmatpush.msrb.mxu3 %v2563_v3 }
 0x1b3   :  { %961 = vmatpush.msrb.mxu0 %v2566_v2  ;;  %981 = vmatpush.msrb.mxu1 %v2569_v4 }
 0x1b4   :  { %1001 = vmatpush.msrb.mxu2 %v2572_v9  ;;  %1021 = vmatpush.msrb.mxu3 %v2575_v10 }
 0x1b5   :  { %962 = vmatpush.msrb.mxu0 %v2578_v11  ;;  %982 = vmatpush.msrb.mxu1 %v2581_v12 }
 0x1b6   :  { %1002 = vmatpush.msrb.mxu2 %v2584_v13  ;;  %1022 = vmatpush.msrb.mxu3 %v2587_v14 }
 0x1b7   :  { %963 = vmatpush.msrb.mxu0 %v2590_v15  ;;  %983 = vmatpush.msrb.mxu1 %v2593_v16 }
 0x1b8   :  { %1003 = vmatpush.msrb.mxu2 %v2596_v17  ;;  %1023 = vmatpush.msrb.mxu3 %v2599_v18 }
 0x1b9   :  { %964 = vmatpush.msrb.mxu0 %v2602_v19  ;;  %984 = vmatpush.msrb.mxu1 %v2605_v22 }
 0x1ba   :  { %1004 = vmatpush.msrb.mxu2 %v2608_v23  ;;  %1024 = vmatpush.msrb.mxu3 %v2611_v24  ;;  %v2629_v24 = vld [vmem:[#allocation3 + $0x28] sm:$0xff] }
 0x1bb   :  { %965 = vmatpush.msrb.mxu0 %v2614_v25  ;;  %985 = vmatpush.msrb.mxu1 %v2617_v26  ;;  %3087 = vst [vmem:[#allocation28_spill] sm:$0xff] %v2629_v24  ;;  %v3088_v26 = vld [vmem:[#allocation39_spill] sm:$0xff]  ;;  %v3089_v25 = vld [vmem:[#allocation40_spill] sm:$0xff] }
 0x1bc   :  { %1005 = vmatpush.msrb.mxu2 %v2620_v27  ;;  %1025 = vmatpush.msrb.mxu3 %v2623_v28 }
 0x1bd   :  { %966 = vmatpush.msrb.mxu0 %v2626_v29  ;;  %986 = vmatpush.msrb.mxu1 %v2629_v24 }
 0x1be   :  { %1006 = vmatpush.msrb.mxu2 %v3058_v30  ;;  %1026 = vmatpush.msrb.mxu3 %v3059_v31  ;;  %v3090_v31 = vld [vmem:[#allocation42_spill] sm:$0xff] }
 0x1bf   :  { %967 = vmatpush.msrb.mxu0 %v3060_v32  ;;  %987 = vmatpush.msrb.mxu1 %v3061_v33 }
 0x1c0   :  { %1007 = vmatpush.msrb.mxu2 %v3062_v35  ;;  %1027 = vmatpush.msrb.mxu3 %v3063_v36 }
 0x21c   :  { %v669_v28 = vpop.f32.mrf.mxu0  ;;  %v689_v27 = vpop.f32.mrf.mxu1 }
 0x21d   :  { %v670_v29 = vadd.f32 %v669_v28, %v3088_v26  ;;  %v690_v23 = vadd.f32 %v689_v27, %v3089_v25  ;;  %v3091_v25 = vld [vmem:[#allocation41_spill] sm:$0xff] }
 0x21f   :  { %v1608_v22 = vmul.f32 -1.442695, %v670_v29  ;;  %v1609_v24 = vmul.f32 -1.442695, %v690_v23 }
 0x221   :  { %1663 = vpow2.f32 %v1608_v22 }
 0x222   :  { %1665 = vpow2.f32 %v1609_v24 }
 0x223   :  { %v729_v30 = vpop.f32.mrf.mxu3  ;;  %v709_v36 = vpop.f32.mrf.mxu2 }
 0x224   :  { %v730_v19 = vadd.f32 %v729_v30, %v3090_v31  ;;  %v710_v27 = vadd.f32 %v709_v36, %v3091_v25 }
 0x226   :  { %v1610_v32 = vmul.f32 -1.442695, %v730_v19 }
 0x227   :  { %v1664_v18 = vpop.eup %1663 }
 0x228   :  { %v1666_v33 = vpop.eup %1665  ;;  %v735_v17 = vadd.f32 1.0, %v1664_v18  ;;  %1667 = vpow2.f32 %v1610_v32 }
 0x229   :  { %v754_v35 = vadd.f32 1.0, %v1666_v33 }
 0x22a   :  { %1669 = vrcp.f32 %v735_v17  ;;  %v747_v19 = vand.u32 2147483648, %v735_v17  ;;  %v745_v32 = vand.u32 2147483647, %v735_v17  ;;  %vm741_vm11 = vweird.f32 %v735_v17 }
 0x22b   :  { %1671 = vrcp.f32 %v754_v35  ;;  %v766_v31 = vand.u32 2147483648, %v754_v35  ;;  %v764_v15 = vand.u32 2147483647, %v754_v35  ;;  %vm760_vm12 = vweird.f32 %v754_v35 }
 0x22c   :  { %v748_v36 = vor.u32 1.1754944e-38, %v747_v19  ;;  %vm746_vm15 = vcmp.eq.f32.partialorder %v745_v32, 8.507059e+37 }
 0x22d   :  { %vm765_vm0 = vcmp.eq.f32.partialorder %v764_v15, 8.507059e+37 }
 0x22e   :  { %v1668_v16 = vpop.eup %1667 }
 0x22f   :  { %v774_v26 = vadd.f32 1.0, %v1668_v16 }
 0x230   :  { %v1670_v28 = vpop.eup %1669 }
 0x231   :  { %v1672_v23 = vpop.eup %1671  ;;  %v737_v22 = vmul.f32 %v1670_v28, %v735_v17  ;;  %1673 = vrcp.f32 %v774_v26  ;;  %vm742_vm9 = vweird.f32 %v1670_v28  ;;  %v786_v19 = vand.u32 2147483648, %v774_v26 }
 0x232   :  { %v756_v24 = vmul.f32 %v1672_v23, %v754_v35  ;;  %1675 = vtanh.f32 %v710_v27  ;;  %vm761_vm10 = vweird.f32 %v1672_v23  ;;  %vm743_vm13 = vmor %vm741_vm11, %vm742_vm9  ;;  %vm780_vm2 = vweird.f32 %v774_v26 }
 0x233   :  { %v738_v29 = vsub.f32 1.0, %v737_v22  ;;  %vm762_vm14 = vmor %vm760_vm12, %vm761_vm10  ;;  %v767_v22 = vor.u32 1.1754944e-38, %v766_v31  ;;  %v787_v32 = vor.u32 1.1754944e-38, %v786_v19  ;;  %v3110_v19 = vld [vmem:[#allocation27_spill] sm:$0xff] }
 0x234   :  { %v757_v30 = vsub.f32 1.0, %v756_v24 }
 0x235   :  { %v739_v18 = vmul.f32 %v1670_v28, %v738_v29 }
 0x236   :  { %v758_v33 = vmul.f32 %v1672_v23, %v757_v30 }
 0x237   :  { %v1674_v14 = vpop.eup %1673  ;;  %v740_v16 = vadd.f32 %v1670_v28, %v739_v18 }
 0x238   :  { %v759_v25 = vadd.f32 %v1672_v23, %v758_v33  ;;  %v776_v13 = vmul.f32 %v1674_v14, %v774_v26  ;;  %v1676_v27 = vpop.eup %1675  ;;  %vm781_vm1 = vweird.f32 %v1674_v14  ;;  %v3099_v33 = vld [vmem:[#allocation16_spill] sm:$0xff] }
 0x239   :  { %v744_v24 = vsel %vm743_vm13, %v1670_v28, %v740_v16  ;;  %v784_v28 = vand.u32 2147483647, %v774_v26  ;;  %vm782_vm3 = vmor %vm780_vm2, %vm781_vm1  ;;  %v3098_v26 = vld [vmem:[#allocation15_spill] sm:$0xff]  ;;  %v3100_v16 = vld [vmem:[#allocation18_spill] sm:$0xff] }
 0x23a   :  { %v749_v12 = vsel %vm746_vm15, %v748_v36, %v744_v24  ;;  %v763_v29 = vsel %vm762_vm14, %v1672_v23, %v759_v25  ;;  %v777_v11 = vsub.f32 1.0, %v776_v13  ;;  %v3101_v36 = vld [vmem:[#allocation17_spill] sm:$0xff]  ;;  %v3102_v25 = vld [vmem:[#allocation19_spill] sm:$0xff]  ;;  %v3104_v24 = vld [vmem:[#allocation22_spill] sm:$0xff] }
 0x23b   :  { %v768_v30 = vsel %vm765_vm0, %v767_v22, %v763_v29  ;;  %v791_v10 = vmul.f32 %v1676_v27, %v749_v12  ;;  %vm785_vm4 = vcmp.eq.f32.partialorder %v784_v28, 8.507059e+37  ;;  %v3096_v12 = vld [vmem:[#allocation14_spill] sm:$0xff]  ;;  %v3103_v22 = vld [vmem:[#allocation20_spill] sm:$0xff]  ;;  %v3105_v27 = vld [vmem:[#allocation21_spill] sm:$0xff] }
 0x23c   :  { %v790_v9 = vmul.f32 %v768_v30, %v2455_v21  ;;  %v778_v18 = vmul.f32 %v1674_v14, %v777_v11  ;;  %v3092_v21 = vld [vmem:[#allocation10_spill] sm:$0xff]  ;;  %v3095_v11 = vld [vmem:[#allocation12_spill] sm:$0xff]  ;;  %v3106_v29 = vld [vmem:[#allocation23_spill] sm:$0xff] }
 0x23d   :  { %v3107_v30 = vld [vmem:[#allocation24_spill] sm:$0xff] }
 0x23e   :  { %v2643_v17 = vadd.f32 %v791_v10, %v790_v9  ;;  %v779_v35 = vadd.f32 %v1674_v14, %v778_v18  ;;  %v3093_v9 = vld [vmem:[#allocation9_spill] sm:$0xff]  ;;  %v3094_v10 = vld [vmem:[#allocation11_spill] sm:$0xff]  ;;  %v3108_v18 = vld [vmem:[#allocation26_spill] sm:$0xff] }
 0x23f   :  { %v3111_v28 = vld [vmem:[#allocation28_spill] sm:$0xff] }
 0x240   :  { %1677 = vtanh.f32 %v2643_v17  ;;  %v783_v31 = vsel %vm782_vm3, %v1674_v14, %v779_v35  ;;  %v3097_v14 = vld [vmem:[#allocation13_spill] sm:$0xff] }
 0x241   :  { %v788_v13 = vsel %vm785_vm4, %v787_v32, %v783_v31  ;;  %v3109_v35 = vld [vmem:[#allocation25_spill] sm:$0xff]  ;;  %v2704_v31 = vld [vmem:[#allocation3 + $0x30] sm:$0xff]  ;;  %v2707_v32 = vld [vmem:[#allocation3 + $0x38] sm:$0xff] }
 0x242   :  { %3112 = vst [vmem:[#allocation29_spill] sm:$0xff] %v2704_v31 }
 0x243   :  { %3113 = vst [vmem:[#allocation30_spill] sm:$0xff] %v2707_v32 }
 0x246   :  { %v1678_v15 = vpop.eup %1677 }
 0x247   :  { %v794_v23 = vmul.f32 %v1678_v15, %v788_v13  ;;  %v2710_v15 = vld [vmem:[#allocation3] sm:$0xff]  ;;  %v2713_v13 = vld [vmem:[#allocation3 + $0x8] sm:$0xff] }
 0x248   :  { %3114 = vst [vmem:[#allocation31_spill] sm:$0xff] %v2710_v15 }
 0x249   :  { %818 = vmatmul.f32.vlgmr.msra.gmra.mxu0 %v794_v23  ;;  %838 = vmatmul.f32.vlgmr.msra.gmra.mxu1 %v794_v23  ;;  %3115 = vst [vmem:[#allocation32_spill] sm:$0xff] %v2713_v13 }
 0x24a   :  { %858 = vmatmul.f32.vlgmr.msra.gmra.mxu2 %v794_v23  ;;  %878 = vmatmul.f32.vlgmr.msra.gmra.mxu3 %v794_v23  ;;  %v2716_v23 = vld [vmem:[#allocation3 + $0x10] sm:$0xff] }
 0x24b   :  { %1102 = vmatpush.msra.mxu0 %v2458_v47  ;;  %1122 = vmatpush.msra.mxu1 %v2461_v37  ;;  %3116 = vst [vmem:[#allocation33_spill] sm:$0xff] %v2716_v23 }
 0x24c   :  { %1142 = vmatpush.msra.mxu2 %v2464_v38  ;;  %1162 = vmatpush.msra.mxu3 %v2467_v39 }
 0x24d   :  { %1103 = vmatpush.msra.mxu0 %v2470_v40  ;;  %1123 = vmatpush.msra.mxu1 %v2473_v41 }
 0x24e   :  { %1143 = vmatpush.msra.mxu2 %v2476_v42  ;;  %1163 = vmatpush.msra.mxu3 %v2479_v43 }
 0x24f   :  { %1104 = vmatpush.msra.mxu0 %v2482_v44  ;;  %1124 = vmatpush.msra.mxu1 %v2485_v45 }
 0x250   :  { %1144 = vmatpush.msra.mxu2 %v2488_v46  ;;  %1164 = vmatpush.msra.mxu3 %v2491_v48 }
 0x251   :  { %1105 = vmatpush.msra.mxu0 %v2494_v49  ;;  %1125 = vmatpush.msra.mxu1 %v2497_v50 }
 0x252   :  { %1145 = vmatpush.msra.mxu2 %v2500_v51  ;;  %1165 = vmatpush.msra.mxu3 %v2503_v55 }
 0x253   :  { %1106 = vmatpush.msra.mxu0 %v2506_v63  ;;  %1126 = vmatpush.msra.mxu1 %v2509_v54 }
 0x254   :  { %1146 = vmatpush.msra.mxu2 %v2512_v6  ;;  %1166 = vmatpush.msra.mxu3 %v2515_v20 }
 0x255   :  { %1107 = vmatpush.msra.mxu0 %v2518_v1  ;;  %1127 = vmatpush.msra.mxu1 %v2521_v60 }
 0x256   :  { %1147 = vmatpush.msra.mxu2 %v2524_v58  ;;  %1167 = vmatpush.msra.mxu3 %v2527_v8 }
 0x257   :  { %1108 = vmatpush.msra.mxu0 %v2530_v57  ;;  %1128 = vmatpush.msra.mxu1 %v2533_v52 }
 0x258   :  { %1148 = vmatpush.msra.mxu2 %v2536_v53  ;;  %1168 = vmatpush.msra.mxu3 %v2539_v7 }
 0x259   :  { %1109 = vmatpush.msra.mxu0 %v2542_v59  ;;  %1129 = vmatpush.msra.mxu1 %v2545_v34 }
 0x25a   :  { %1149 = vmatpush.msra.mxu2 %v2548_v61  ;;  %1169 = vmatpush.msra.mxu3 %v2551_v56 }
 0x25b   :  { %1110 = vmatpush.msra.mxu0 %v2554_v0  ;;  %1130 = vmatpush.msra.mxu1 %v2557_v5 }
 0x25c   :  { %1150 = vmatpush.msra.mxu2 %v2560_v62  ;;  %1170 = vmatpush.msra.mxu3 %v2563_v3 }
 0x25d   :  { %1111 = vmatpush.msra.mxu0 %v2566_v2  ;;  %1131 = vmatpush.msra.mxu1 %v2569_v4 }
 0x25e   :  { %1151 = vmatpush.msra.mxu2 %v3092_v21  ;;  %1171 = vmatpush.msra.mxu3 %v3093_v9 }
 0x25f   :  { %1112 = vmatpush.msra.mxu0 %v3094_v10  ;;  %1132 = vmatpush.msra.mxu1 %v3095_v11 }
 0x260   :  { %1152 = vmatpush.msra.mxu2 %v3096_v12  ;;  %1172 = vmatpush.msra.mxu3 %v3097_v14 }
 0x261   :  { %1113 = vmatpush.msra.mxu0 %v3098_v26  ;;  %1133 = vmatpush.msra.mxu1 %v3099_v33 }
 0x262   :  { %1153 = vmatpush.msra.mxu2 %v3100_v16  ;;  %1173 = vmatpush.msra.mxu3 %v3101_v36 }
 0x263   :  { %1114 = vmatpush.msra.mxu0 %v3102_v25  ;;  %1134 = vmatpush.msra.mxu1 %v3103_v22 }
 0x264   :  { %1154 = vmatpush.msra.mxu2 %v3104_v24  ;;  %1174 = vmatpush.msra.mxu3 %v3105_v27 }
 0x265   :  { %1115 = vmatpush.msra.mxu0 %v3106_v29  ;;  %1135 = vmatpush.msra.mxu1 %v3107_v30 }
 0x266   :  { %1155 = vmatpush.msra.mxu2 %v3108_v18  ;;  %1175 = vmatpush.msra.mxu3 %v3109_v35  ;;  %v3118_v35 = vld [vmem:[#allocation43_spill] sm:$0xff]  ;;  %v3119_v18 = vld [vmem:[#allocation44_spill] sm:$0xff] }
 0x267   :  { %1116 = vmatpush.msra.mxu0 %v3110_v19  ;;  %1136 = vmatpush.msra.mxu1 %v3111_v28  ;;  %v2719_v28 = vld [vmem:[#allocation3 + $0x18] sm:$0xff] }
 0x268   :  { %1156 = vmatpush.msra.mxu2 %v2704_v31  ;;  %1176 = vmatpush.msra.mxu3 %v2707_v32  ;;  %3117 = vst [vmem:[#allocation34_spill] sm:$0xff] %v2719_v28 }
 0x269   :  { %1117 = vmatpush.msra.mxu0 %v2710_v15  ;;  %1137 = vmatpush.msra.mxu1 %v2713_v13  ;;  %v3120_v13 = vld [vmem:[#allocation46_spill] sm:$0xff] }
 0x26a   :  { %1157 = vmatpush.msra.mxu2 %v2716_v23  ;;  %1177 = vmatpush.msra.mxu3 %v2719_v28 }
 0x2c6   :  { %v819_v31 = vpop.f32.mrf.mxu0  ;;  %v839_v19 = vpop.f32.mrf.mxu1 }
 0x2c7   :  { %v820_v32 = vadd.f32 %v819_v31, %v3118_v35  ;;  %v840_v30 = vadd.f32 %v839_v19, %v3119_v18  ;;  %v3121_v18 = vld [vmem:[#allocation45_spill] sm:$0xff] }
 0x2c9   :  { %v1611_v29 = vmul.f32 -1.442695, %v820_v32  ;;  %v1612_v15 = vmul.f32 -1.442695, %v840_v30 }
 0x2cb   :  { %1679 = vpow2.f32 %v1611_v29 }
 0x2cc   :  { %1681 = vpow2.f32 %v1612_v15 }
 0x2cd   :  { %v879_v27 = vpop.f32.mrf.mxu3  ;;  %v859_v28 = vpop.f32.mrf.mxu2 }
 0x2ce   :  { %v880_v24 = vadd.f32 %v879_v27, %v3120_v13  ;;  %v860_v19 = vadd.f32 %v859_v28, %v3121_v18 }
 0x2d0   :  { %v1613_v22 = vmul.f32 -1.442695, %v880_v24 }
 0x2d1   :  { %v1680_v25 = vpop.eup %1679 }
 0x2d2   :  { %v1682_v23 = vpop.eup %1681  ;;  %v885_v36 = vadd.f32 1.0, %v1680_v25  ;;  %1683 = vpow2.f32 %v1613_v22 }
 0x2d3   :  { %v904_v16 = vadd.f32 1.0, %v1682_v23 }
 0x2d4   :  { %1685 = vrcp.f32 %v885_v36  ;;  %v897_v24 = vand.u32 2147483648, %v885_v36  ;;  %v895_v22 = vand.u32 2147483647, %v885_v36  ;;  %vm891_vm7 = vweird.f32 %v885_v36 }
 0x2d5   :  { %1687 = vrcp.f32 %v904_v16  ;;  %v916_v13 = vand.u32 2147483648, %v904_v16  ;;  %v914_v26 = vand.u32 2147483647, %v904_v16  ;;  %vm910_vm8 = vweird.f32 %v904_v16 }
 0x2d6   :  { %v898_v28 = vor.u32 1.1754944e-38, %v897_v24  ;;  %vm896_vm11 = vcmp.eq.f32.partialorder %v895_v22, 8.507059e+37 }
 0x2d7   :  { %vm915_vm12 = vcmp.eq.f32.partialorder %v914_v26, 8.507059e+37 }
 0x2d8   :  { %v1684_v33 = vpop.eup %1683 }
 0x2d9   :  { %v924_v35 = vadd.f32 1.0, %v1684_v33 }
 0x2da   :  { %v1686_v31 = vpop.eup %1685 }
 0x2db   :  { %v1688_v30 = vpop.eup %1687  ;;  %v887_v29 = vmul.f32 %v1686_v31, %v885_v36  ;;  %1689 = vrcp.f32 %v924_v35  ;;  %vm892_vm5 = vweird.f32 %v1686_v31  ;;  %v936_v24 = vand.u32 2147483648, %v924_v35 }
 0x2dc   :  { %v906_v32 = vmul.f32 %v1688_v30, %v904_v16  ;;  %1691 = vtanh.f32 %v860_v19  ;;  %vm911_vm6 = vweird.f32 %v1688_v30  ;;  %vm893_vm9 = vmor %vm891_vm7, %vm892_vm5  ;;  %vm930_vm14 = vweird.f32 %v924_v35 }
 0x2dd   :  { %v888_v15 = vsub.f32 1.0, %v887_v29  ;;  %vm912_vm10 = vmor %vm910_vm8, %vm911_vm6  ;;  %v917_v29 = vor.u32 1.1754944e-38, %v916_v13  ;;  %v937_v22 = vor.u32 1.1754944e-38, %v936_v24  ;;  %v3140_v24 = vld [vmem:[#allocation27_spill] sm:$0xff] }
 0x2de   :  { %v907_v27 = vsub.f32 1.0, %v906_v32 }
 0x2df   :  { %v889_v25 = vmul.f32 %v1686_v31, %v888_v15 }
 0x2e0   :  { %v908_v23 = vmul.f32 %v1688_v30, %v907_v27 }
 0x2e1   :  { %v1690_v14 = vpop.eup %1689  ;;  %v890_v33 = vadd.f32 %v1686_v31, %v889_v25 }
 0x2e2   :  { %v909_v18 = vadd.f32 %v1688_v30, %v908_v23  ;;  %v926_v12 = vmul.f32 %v1690_v14, %v924_v35  ;;  %v1692_v19 = vpop.eup %1691  ;;  %vm931_vm13 = vweird.f32 %v1690_v14  ;;  %v3129_v23 = vld [vmem:[#allocation16_spill] sm:$0xff] }
 0x2e3   :  { %v894_v32 = vsel %vm893_vm9, %v1686_v31, %v890_v33  ;;  %v934_v31 = vand.u32 2147483647, %v924_v35  ;;  %vm932_vm15 = vmor %vm930_vm14, %vm931_vm13  ;;  %v3128_v35 = vld [vmem:[#allocation15_spill] sm:$0xff]  ;;  %v3130_v33 = vld [vmem:[#allocation18_spill] sm:$0xff] }
 0x2e4   :  { %v899_v11 = vsel %vm896_vm11, %v898_v28, %v894_v32  ;;  %v913_v15 = vsel %vm912_vm10, %v1688_v30, %v909_v18  ;;  %v927_v10 = vsub.f32 1.0, %v926_v12  ;;  %v3131_v28 = vld [vmem:[#allocation17_spill] sm:$0xff]  ;;  %v3132_v18 = vld [vmem:[#allocation19_spill] sm:$0xff]  ;;  %v3134_v32 = vld [vmem:[#allocation22_spill] sm:$0xff] }
 0x2e5   :  { %v918_v27 = vsel %vm915_vm12, %v917_v29, %v913_v15  ;;  %v941_v9 = vmul.f32 %v1692_v19, %v899_v11  ;;  %vm935_vm0 = vcmp.eq.f32.partialorder %v934_v31, 8.507059e+37  ;;  %v3126_v11 = vld [vmem:[#allocation14_spill] sm:$0xff]  ;;  %v3133_v29 = vld [vmem:[#allocation20_spill] sm:$0xff]  ;;  %v3135_v19 = vld [vmem:[#allocation21_spill] sm:$0xff] }
 0x2e6   :  { %v940_v21 = vmul.f32 %v918_v27, %v2643_v17  ;;  %v928_v25 = vmul.f32 %v1690_v14, %v927_v10  ;;  %v3122_v17 = vld [vmem:[#allocation10_spill] sm:$0xff]  ;;  %v3125_v10 = vld [vmem:[#allocation12_spill] sm:$0xff]  ;;  %v3136_v15 = vld [vmem:[#allocation23_spill] sm:$0xff] }
 0x2e7   :  { %v3137_v27 = vld [vmem:[#allocation24_spill] sm:$0xff] }
 0x2e8   :  { %v2727_v36 = vadd.f32 %v941_v9, %v940_v21  ;;  %v929_v16 = vadd.f32 %v1690_v14, %v928_v25  ;;  %v3123_v21 = vld [vmem:[#allocation9_spill] sm:$0xff]  ;;  %v3124_v9 = vld [vmem:[#allocation11_spill] sm:$0xff]  ;;  %v3138_v25 = vld [vmem:[#allocation26_spill] sm:$0xff] }
 0x2e9   :  { %v3141_v31 = vld [vmem:[#allocation28_spill] sm:$0xff] }
 0x2ea   :  { %1693 = vtanh.f32 %v2727_v36  ;;  %v933_v13 = vsel %vm932_vm15, %v1690_v14, %v929_v16  ;;  %v3127_v14 = vld [vmem:[#allocation13_spill] sm:$0xff] }
 0x2eb   :  { %v938_v12 = vsel %vm935_vm0, %v937_v22, %v933_v13  ;;  %v3139_v16 = vld [vmem:[#allocation25_spill] sm:$0xff]  ;;  %v3143_v22 = vld [vmem:[#allocation30_spill] sm:$0xff] }
 0x2ec   :  { %v3142_v13 = vld [vmem:[#allocation29_spill] sm:$0xff] }
 0x2f0   :  { %v1694_v26 = vpop.eup %1693 }
 0x2f1   :  { %v944_v30 = vmul.f32 %v1694_v26, %v938_v12  ;;  %v3144_v26 = vld [vmem:[#allocation31_spill] sm:$0xff]  ;;  %v3145_v12 = vld [vmem:[#allocation32_spill] sm:$0xff] }
 0x2f3   :  { %968 = vmatmul.f32.vlgmr.msrb.gmra.mxu0 %v944_v30  ;;  %988 = vmatmul.f32.vlgmr.msrb.gmra.mxu1 %v944_v30 }
 0x2f4   :  { %1008 = vmatmul.f32.vlgmr.msrb.gmra.mxu2 %v944_v30  ;;  %1028 = vmatmul.f32.vlgmr.msrb.gmra.mxu3 %v944_v30  ;;  %v3146_v30 = vld [vmem:[#allocation33_spill] sm:$0xff] }
 0x2f5   :  { %1252 = vmatpush.msrb.mxu0 %v2458_v47  ;;  %1272 = vmatpush.msrb.mxu1 %v2461_v37 }
 0x2f6   :  { %1292 = vmatpush.msrb.mxu2 %v2464_v38  ;;  %1312 = vmatpush.msrb.mxu3 %v2467_v39 }
 0x2f7   :  { %1253 = vmatpush.msrb.mxu0 %v2470_v40  ;;  %1273 = vmatpush.msrb.mxu1 %v2473_v41 }
 0x2f8   :  { %1293 = vmatpush.msrb.mxu2 %v2476_v42  ;;  %1313 = vmatpush.msrb.mxu3 %v2479_v43 }
 0x2f9   :  { %1254 = vmatpush.msrb.mxu0 %v2482_v44  ;;  %1274 = vmatpush.msrb.mxu1 %v2485_v45 }
 0x2fa   :  { %1294 = vmatpush.msrb.mxu2 %v2488_v46  ;;  %1314 = vmatpush.msrb.mxu3 %v2491_v48 }
 0x2fb   :  { %1255 = vmatpush.msrb.mxu0 %v2494_v49  ;;  %1275 = vmatpush.msrb.mxu1 %v2497_v50 }
 0x2fc   :  { %1295 = vmatpush.msrb.mxu2 %v2500_v51  ;;  %1315 = vmatpush.msrb.mxu3 %v2503_v55 }
 0x2fd   :  { %1256 = vmatpush.msrb.mxu0 %v2506_v63  ;;  %1276 = vmatpush.msrb.mxu1 %v2509_v54 }
 0x2fe   :  { %1296 = vmatpush.msrb.mxu2 %v2512_v6  ;;  %1316 = vmatpush.msrb.mxu3 %v2515_v20 }
 0x2ff   :  { %1257 = vmatpush.msrb.mxu0 %v2518_v1  ;;  %1277 = vmatpush.msrb.mxu1 %v2521_v60 }
 0x300   :  { %1297 = vmatpush.msrb.mxu2 %v2524_v58  ;;  %1317 = vmatpush.msrb.mxu3 %v2527_v8 }
 0x301   :  { %1258 = vmatpush.msrb.mxu0 %v2530_v57  ;;  %1278 = vmatpush.msrb.mxu1 %v2533_v52 }
 0x302   :  { %1298 = vmatpush.msrb.mxu2 %v2536_v53  ;;  %1318 = vmatpush.msrb.mxu3 %v2539_v7 }
 0x303   :  { %1259 = vmatpush.msrb.mxu0 %v2542_v59  ;;  %1279 = vmatpush.msrb.mxu1 %v2545_v34 }
 0x304   :  { %1299 = vmatpush.msrb.mxu2 %v2548_v61  ;;  %1319 = vmatpush.msrb.mxu3 %v2551_v56 }
 0x305   :  { %1260 = vmatpush.msrb.mxu0 %v2554_v0  ;;  %1280 = vmatpush.msrb.mxu1 %v2557_v5 }
 0x306   :  { %1300 = vmatpush.msrb.mxu2 %v2560_v62  ;;  %1320 = vmatpush.msrb.mxu3 %v2563_v3 }
 0x307   :  { %1261 = vmatpush.msrb.mxu0 %v2566_v2  ;;  %1281 = vmatpush.msrb.mxu1 %v2569_v4 }
 0x308   :  { %1301 = vmatpush.msrb.mxu2 %v3122_v17  ;;  %1321 = vmatpush.msrb.mxu3 %v3123_v21 }
 0x309   :  { %1262 = vmatpush.msrb.mxu0 %v3124_v9  ;;  %1282 = vmatpush.msrb.mxu1 %v3125_v10 }
 0x30a   :  { %1302 = vmatpush.msrb.mxu2 %v3126_v11  ;;  %1322 = vmatpush.msrb.mxu3 %v3127_v14 }
 0x30b   :  { %1263 = vmatpush.msrb.mxu0 %v3128_v35  ;;  %1283 = vmatpush.msrb.mxu1 %v3129_v23 }
 0x30c   :  { %1303 = vmatpush.msrb.mxu2 %v3130_v33  ;;  %1323 = vmatpush.msrb.mxu3 %v3131_v28 }
 0x30d   :  { %1264 = vmatpush.msrb.mxu0 %v3132_v18  ;;  %1284 = vmatpush.msrb.mxu1 %v3133_v29 }
 0x30e   :  { %1304 = vmatpush.msrb.mxu2 %v3134_v32  ;;  %1324 = vmatpush.msrb.mxu3 %v3135_v19  ;;  %v3148_v19 = vld [vmem:[#allocation47_spill] sm:$0xff]  ;;  %v3149_v32 = vld [vmem:[#allocation48_spill] sm:$0xff] }
 0x30f   :  { %1265 = vmatpush.msrb.mxu0 %v3136_v15  ;;  %1285 = vmatpush.msrb.mxu1 %v3137_v27  ;;  %v3147_v15 = vld [vmem:[#allocation34_spill] sm:$0xff] }
 0x310   :  { %1305 = vmatpush.msrb.mxu2 %v3138_v25  ;;  %1325 = vmatpush.msrb.mxu3 %v3139_v16 }
 0x311   :  { %1266 = vmatpush.msrb.mxu0 %v3140_v24  ;;  %1286 = vmatpush.msrb.mxu1 %v3141_v31 }
 0x312   :  { %1306 = vmatpush.msrb.mxu2 %v3142_v13  ;;  %1326 = vmatpush.msrb.mxu3 %v3143_v22  ;;  %v3150_v22 = vld [vmem:[#allocation50_spill] sm:$0xff] }
 0x313   :  { %1267 = vmatpush.msrb.mxu0 %v3144_v26  ;;  %1287 = vmatpush.msrb.mxu1 %v3145_v12 }
 0x314   :  { %1307 = vmatpush.msrb.mxu2 %v3146_v30  ;;  %1327 = vmatpush.msrb.mxu3 %v3147_v15 }
 0x370   :  { %v969_v27 = vpop.f32.mrf.mxu0  ;;  %v989_v25 = vpop.f32.mrf.mxu1 }
 0x371   :  { %v970_v16 = vadd.f32 %v969_v27, %v3148_v19  ;;  %v990_v24 = vadd.f32 %v989_v25, %v3149_v32  ;;  %v3151_v32 = vld [vmem:[#allocation49_spill] sm:$0xff] }
 0x373   :  { %v1614_v29 = vmul.f32 -1.442695, %v970_v16  ;;  %v1615_v31 = vmul.f32 -1.442695, %v990_v24 }
 0x375   :  { %1695 = vpow2.f32 %v1614_v29 }
 0x376   :  { %1697 = vpow2.f32 %v1615_v31 }
 0x377   :  { %v1029_v13 = vpop.f32.mrf.mxu3  ;;  %v1009_v15 = vpop.f32.mrf.mxu2 }
 0x378   :  { %v1030_v18 = vadd.f32 %v1029_v13, %v3150_v22  ;;  %v1010_v25 = vadd.f32 %v1009_v15, %v3151_v32 }
 0x37a   :  { %v1616_v26 = vmul.f32 -1.442695, %v1030_v18 }
 0x37b   :  { %v1696_v28 = vpop.eup %1695 }
 0x37c   :  { %v1698_v12 = vpop.eup %1697  ;;  %v1035_v33 = vadd.f32 1.0, %v1696_v28  ;;  %1699 = vpow2.f32 %v1616_v26 }
 0x37d   :  { %v1054_v30 = vadd.f32 1.0, %v1698_v12 }
 0x37e   :  { %1701 = vrcp.f32 %v1035_v33  ;;  %v1047_v18 = vand.u32 2147483648, %v1035_v33  ;;  %v1045_v26 = vand.u32 2147483647, %v1035_v33  ;;  %vm1041_vm3 = vweird.f32 %v1035_v33 }
 0x37f   :  { %1703 = vrcp.f32 %v1054_v30  ;;  %v1066_v22 = vand.u32 2147483648, %v1054_v30  ;;  %v1064_v35 = vand.u32 2147483647, %v1054_v30  ;;  %vm1060_vm4 = vweird.f32 %v1054_v30 }
 0x380   :  { %v1048_v15 = vor.u32 1.1754944e-38, %v1047_v18  ;;  %vm1046_vm7 = vcmp.eq.f32.partialorder %v1045_v26, 8.507059e+37 }
 0x381   :  { %vm1065_vm8 = vcmp.eq.f32.partialorder %v1064_v35, 8.507059e+37 }
 0x382   :  { %v1700_v23 = vpop.eup %1699 }
 0x383   :  { %v1074_v19 = vadd.f32 1.0, %v1700_v23 }
 0x384   :  { %v1702_v27 = vpop.eup %1701 }
 0x385   :  { %v1704_v16 = vpop.eup %1703  ;;  %v1037_v29 = vmul.f32 %v1702_v27, %v1035_v33  ;;  %1705 = vrcp.f32 %v1074_v19  ;;  %vm1042_vm1 = vweird.f32 %v1702_v27  ;;  %v1086_v18 = vand.u32 2147483648, %v1074_v19 }
 0x386   :  { %v1056_v24 = vmul.f32 %v1704_v16, %v1054_v30  ;;  %1707 = vtanh.f32 %v1010_v25  ;;  %vm1061_vm2 = vweird.f32 %v1704_v16  ;;  %vm1043_vm5 = vmor %vm1041_vm3, %vm1042_vm1  ;;  %vm1080_vm10 = vweird.f32 %v1074_v19 }
 0x387   :  { %v1038_v31 = vsub.f32 1.0, %v1037_v29  ;;  %vm1062_vm6 = vmor %vm1060_vm4, %vm1061_vm2  ;;  %v1067_v29 = vor.u32 1.1754944e-38, %v1066_v22  ;;  %v1087_v26 = vor.u32 1.1754944e-38, %v1086_v18 }
 0x388   :  { %v1057_v13 = vsub.f32 1.0, %v1056_v24 }
 0x389   :  { %v1039_v28 = vmul.f32 %v1702_v27, %v1038_v31 }
 0x38a   :  { %v1058_v12 = vmul.f32 %v1704_v16, %v1057_v13 }
 0x38b   :  { %v1706_v14 = vpop.eup %1705  ;;  %v1040_v23 = vadd.f32 %v1702_v27, %v1039_v28 }
 0x38c   :  { %v1059_v32 = vadd.f32 %v1704_v16, %v1058_v12  ;;  %v1076_v11 = vmul.f32 %v1706_v14, %v1074_v19  ;;  %v1708_v25 = vpop.eup %1707  ;;  %vm1081_vm9 = vweird.f32 %v1706_v14 }
 0x38d   :  { %v1044_v24 = vsel %vm1043_vm5, %v1702_v27, %v1040_v23  ;;  %v1084_v27 = vand.u32 2147483647, %v1074_v19  ;;  %vm1082_vm11 = vmor %vm1080_vm10, %vm1081_vm9  ;;  %v3181_v23 = vld [vmem:[#allocation53_spill] sm:$0xff] }
 0x38e   :  { %v1049_v10 = vsel %vm1046_vm7, %v1048_v15, %v1044_v24  ;;  %v1063_v31 = vsel %vm1062_vm6, %v1704_v16, %v1059_v32  ;;  %v1077_v9 = vsub.f32 1.0, %v1076_v11 }
 0x38f   :  { %v1068_v13 = vsel %vm1065_vm8, %v1067_v29, %v1063_v31  ;;  %v1091_v21 = vmul.f32 %v1708_v25, %v1049_v10  ;;  %vm1085_vm12 = vcmp.eq.f32.partialorder %v1084_v27, 8.507059e+37 }
 0x390   :  { %v1090_v17 = vmul.f32 %v1068_v13, %v2727_v36  ;;  %v1078_v28 = vmul.f32 %v1706_v14, %v1077_v9 }
 0x392   :  { %v2799_v33 = vadd.f32 %v1091_v21, %v1090_v17  ;;  %v1079_v30 = vadd.f32 %v1706_v14, %v1078_v28 }
 0x394   :  { %1709 = vtanh.f32 %v2799_v33  ;;  %v1083_v22 = vsel %vm1082_vm11, %v1706_v14, %v1079_v30 }
 0x395   :  { %v1088_v11 = vsel %vm1085_vm12, %v1087_v26, %v1083_v22 }
 0x39a   :  { %v1710_v35 = vpop.eup %1709 }
 0x39b   :  { %v1094_v16 = vmul.f32 %v1710_v35, %v1088_v11 }
 0x39d   :  { %1118 = vmatmul.f32.vlgmr.msra.gmra.mxu0 %v1094_v16  ;;  %1138 = vmatmul.f32.vlgmr.msra.gmra.mxu1 %v1094_v16 }
 0x39e   :  { %1158 = vmatmul.f32.vlgmr.msra.gmra.mxu2 %v1094_v16  ;;  %1178 = vmatmul.f32.vlgmr.msra.gmra.mxu3 %v1094_v16 }
 0x39f   :  { %1402 = vmatpush.msra.mxu0 %v2458_v47  ;;  %1422 = vmatpush.msra.mxu1 %v2461_v37  ;;  %v3152_v47 = vld [vmem:[#allocation10_spill] sm:$0xff]  ;;  %v3153_v37 = vld [vmem:[#allocation9_spill] sm:$0xff] }
 0x3a0   :  { %1442 = vmatpush.msra.mxu2 %v2464_v38  ;;  %1462 = vmatpush.msra.mxu3 %v2467_v39  ;;  %v3154_v38 = vld [vmem:[#allocation11_spill] sm:$0xff]  ;;  %v3155_v39 = vld [vmem:[#allocation12_spill] sm:$0xff] }
 0x3a1   :  { %1403 = vmatpush.msra.mxu0 %v2470_v40  ;;  %1423 = vmatpush.msra.mxu1 %v2473_v41  ;;  %v3156_v40 = vld [vmem:[#allocation14_spill] sm:$0xff]  ;;  %v3157_v41 = vld [vmem:[#allocation13_spill] sm:$0xff] }
 0x3a2   :  { %1443 = vmatpush.msra.mxu2 %v2476_v42  ;;  %1463 = vmatpush.msra.mxu3 %v2479_v43  ;;  %v3158_v42 = vld [vmem:[#allocation15_spill] sm:$0xff]  ;;  %v3159_v43 = vld [vmem:[#allocation16_spill] sm:$0xff] }
 0x3a3   :  { %1404 = vmatpush.msra.mxu0 %v2482_v44  ;;  %1424 = vmatpush.msra.mxu1 %v2485_v45  ;;  %v3160_v44 = vld [vmem:[#allocation18_spill] sm:$0xff]  ;;  %v3161_v45 = vld [vmem:[#allocation17_spill] sm:$0xff] }
 0x3a4   :  { %1444 = vmatpush.msra.mxu2 %v2488_v46  ;;  %1464 = vmatpush.msra.mxu3 %v2491_v48  ;;  %v3162_v46 = vld [vmem:[#allocation19_spill] sm:$0xff]  ;;  %v3163_v48 = vld [vmem:[#allocation20_spill] sm:$0xff] }
 0x3a5   :  { %1405 = vmatpush.msra.mxu0 %v2494_v49  ;;  %1425 = vmatpush.msra.mxu1 %v2497_v50  ;;  %v3164_v49 = vld [vmem:[#allocation22_spill] sm:$0xff]  ;;  %v3165_v50 = vld [vmem:[#allocation21_spill] sm:$0xff] }
 0x3a6   :  { %1445 = vmatpush.msra.mxu2 %v2500_v51  ;;  %1465 = vmatpush.msra.mxu3 %v2503_v55  ;;  %v3166_v51 = vld [vmem:[#allocation23_spill] sm:$0xff]  ;;  %v3167_v55 = vld [vmem:[#allocation24_spill] sm:$0xff] }
 0x3a7   :  { %1406 = vmatpush.msra.mxu0 %v2506_v63  ;;  %1426 = vmatpush.msra.mxu1 %v2509_v54  ;;  %v3168_v63 = vld [vmem:[#allocation26_spill] sm:$0xff]  ;;  %v3169_v54 = vld [vmem:[#allocation25_spill] sm:$0xff] }
 0x3a8   :  { %1446 = vmatpush.msra.mxu2 %v2512_v6  ;;  %1466 = vmatpush.msra.mxu3 %v2515_v20  ;;  %v3170_v6 = vld [vmem:[#allocation27_spill] sm:$0xff]  ;;  %v3171_v20 = vld [vmem:[#allocation28_spill] sm:$0xff] }
 0x3a9   :  { %1407 = vmatpush.msra.mxu0 %v2518_v1  ;;  %1427 = vmatpush.msra.mxu1 %v2521_v60  ;;  %v3172_v1 = vld [vmem:[#allocation29_spill] sm:$0xff]  ;;  %v3173_v60 = vld [vmem:[#allocation30_spill] sm:$0xff] }
 0x3aa   :  { %1447 = vmatpush.msra.mxu2 %v2524_v58  ;;  %1467 = vmatpush.msra.mxu3 %v2527_v8  ;;  %v3174_v58 = vld [vmem:[#allocation31_spill] sm:$0xff]  ;;  %v3175_v8 = vld [vmem:[#allocation32_spill] sm:$0xff] }
 0x3ab   :  { %1408 = vmatpush.msra.mxu0 %v2530_v57  ;;  %1428 = vmatpush.msra.mxu1 %v2533_v52  ;;  %v3176_v57 = vld [vmem:[#allocation33_spill] sm:$0xff]  ;;  %v3177_v52 = vld [vmem:[#allocation34_spill] sm:$0xff] }
 0x3ac   :  { %1448 = vmatpush.msra.mxu2 %v2536_v53  ;;  %1468 = vmatpush.msra.mxu3 %v2539_v7 }
 0x3ad   :  { %1409 = vmatpush.msra.mxu0 %v2542_v59  ;;  %1429 = vmatpush.msra.mxu1 %v2545_v34  ;;  %v3178_v59 = vld [vmem:[#allocation51_spill] sm:$0xff] }
 0x3ae   :  { %1449 = vmatpush.msra.mxu2 %v2548_v61  ;;  %1469 = vmatpush.msra.mxu3 %v2551_v56  ;;  %v3179_v61 = vld [vmem:[#allocation52_spill] sm:$0xff] }
 0x3af   :  { %1410 = vmatpush.msra.mxu0 %v2554_v0  ;;  %1430 = vmatpush.msra.mxu1 %v2557_v5 }
 0x3b0   :  { %1450 = vmatpush.msra.mxu2 %v2560_v62  ;;  %1470 = vmatpush.msra.mxu3 %v2563_v3  ;;  %v3180_v3 = vld [vmem:[#allocation54_spill] sm:$0xff] }
 0x3b1   :  { %1411 = vmatpush.msra.mxu0 %v2566_v2  ;;  %1431 = vmatpush.msra.mxu1 %v2569_v4 }
 0x3b2   :  { %1451 = vmatpush.msra.mxu2 %v3152_v47  ;;  %1471 = vmatpush.msra.mxu3 %v3153_v37 }
 0x3b3   :  { %1412 = vmatpush.msra.mxu0 %v3154_v38  ;;  %1432 = vmatpush.msra.mxu1 %v3155_v39 }
 0x3b4   :  { %1452 = vmatpush.msra.mxu2 %v3156_v40  ;;  %1472 = vmatpush.msra.mxu3 %v3157_v41 }
 0x3b5   :  { %1413 = vmatpush.msra.mxu0 %v3158_v42  ;;  %1433 = vmatpush.msra.mxu1 %v3159_v43 }
 0x3b6   :  { %1453 = vmatpush.msra.mxu2 %v3160_v44  ;;  %1473 = vmatpush.msra.mxu3 %v3161_v45 }
 0x3b7   :  { %1414 = vmatpush.msra.mxu0 %v3162_v46  ;;  %1434 = vmatpush.msra.mxu1 %v3163_v48 }
 0x3b8   :  { %1454 = vmatpush.msra.mxu2 %v3164_v49  ;;  %1474 = vmatpush.msra.mxu3 %v3165_v50 }
 0x3b9   :  { %1415 = vmatpush.msra.mxu0 %v3166_v51  ;;  %1435 = vmatpush.msra.mxu1 %v3167_v55 }
 0x3ba   :  { %1455 = vmatpush.msra.mxu2 %v3168_v63  ;;  %1475 = vmatpush.msra.mxu3 %v3169_v54 }
 0x3bb   :  { %1416 = vmatpush.msra.mxu0 %v3170_v6  ;;  %1436 = vmatpush.msra.mxu1 %v3171_v20 }
 0x3bc   :  { %1456 = vmatpush.msra.mxu2 %v3172_v1  ;;  %1476 = vmatpush.msra.mxu3 %v3173_v60  ;;  %v3182_v60 = vld [vmem:[#allocation55_spill] sm:$0xff] }
 0x3bd   :  { %1417 = vmatpush.msra.mxu0 %v3174_v58  ;;  %1437 = vmatpush.msra.mxu1 %v3175_v8  ;;  %v3183_v8 = vld [vmem:[#allocation56_spill] sm:$0xff] }
 0x3be   :  { %1457 = vmatpush.msra.mxu2 %v3176_v57  ;;  %1477 = vmatpush.msra.mxu3 %v3177_v52 }
 0x41a   :  { %v1119_v53 = vpop.f32.mrf.mxu0  ;;  %v1139_v7 = vpop.f32.mrf.mxu1 }
 0x41b   :  { %v1120_v34 = vadd.f32 %v1119_v53, %v3178_v59  ;;  %v1140_v56 = vadd.f32 %v1139_v7, %v3179_v61  ;;  %v3184_v59 = vld [vmem:[#allocation58_spill] sm:$0xff] }
 0x41d   :  { %v1617_v0 = vmul.f32 -1.442695, %v1120_v34  ;;  %v1618_v5 = vmul.f32 -1.442695, %v1140_v56 }
 0x41f   :  { %1711 = vpow2.f32 %v1617_v0 }
 0x420   :  { %1713 = vpow2.f32 %v1618_v5 }
 0x421   :  { %v1179_v62 = vpop.f32.mrf.mxu3  ;;  %v1159_v10 = vpop.f32.mrf.mxu2 }
 0x422   :  { %v1180_v2 = vadd.f32 %v1179_v62, %v3180_v3  ;;  %v1160_v15 = vadd.f32 %v1159_v10, %v3181_v23 }
 0x424   :  { %v1619_v4 = vmul.f32 -1.442695, %v1180_v2 }
 0x425   :  { %v1712_v36 = vpop.eup %1711 }
 0x426   :  { %v1714_v17 = vpop.eup %1713  ;;  %v1185_v21 = vadd.f32 1.0, %v1712_v36  ;;  %1715 = vpow2.f32 %v1619_v4 }
 0x427   :  { %v1204_v9 = vadd.f32 1.0, %v1714_v17  ;;  %v3185_v17 = vld [vmem:[#allocation57_spill] sm:$0xff] }
 0x428   :  { %1717 = vrcp.f32 %v1185_v21  ;;  %v1197_v13 = vand.u32 2147483648, %v1185_v21  ;;  %v1195_v18 = vand.u32 2147483647, %v1185_v21  ;;  %vm1191_vm15 = vweird.f32 %v1185_v21 }
 0x429   :  { %1719 = vrcp.f32 %v1204_v9  ;;  %v1216_v28 = vand.u32 2147483648, %v1204_v9  ;;  %v1214_v22 = vand.u32 2147483647, %v1204_v9  ;;  %vm1210_vm0 = vweird.f32 %v1204_v9 }
 0x42a   :  { %v1198_v11 = vor.u32 1.1754944e-38, %v1197_v13  ;;  %vm1196_vm3 = vcmp.eq.f32.partialorder %v1195_v18, 8.507059e+37 }
 0x42b   :  { %v1217_v37 = vor.u32 1.1754944e-38, %v1216_v28  ;;  %vm1215_vm4 = vcmp.eq.f32.partialorder %v1214_v22, 8.507059e+37 }
 0x42c   :  { %v1716_v14 = vpop.eup %1715 }
 0x42d   :  { %v1224_v19 = vadd.f32 1.0, %v1716_v14 }
 0x42e   :  { %v1718_v12 = vpop.eup %1717 }
 0x42f   :  { %v1720_v32 = vpop.eup %1719  ;;  %v1187_v29 = vmul.f32 %v1718_v12, %v1185_v21  ;;  %1721 = vrcp.f32 %v1224_v19  ;;  %vm1192_vm13 = vweird.f32 %v1718_v12  ;;  %v1236_v50 = vand.u32 2147483648, %v1224_v19 }
 0x430   :  { %v1206_v24 = vmul.f32 %v1720_v32, %v1204_v9  ;;  %1723 = vtanh.f32 %v1160_v15  ;;  %vm1211_vm14 = vweird.f32 %v1720_v32  ;;  %vm1193_vm1 = vmor %vm1191_vm15, %vm1192_vm13  ;;  %vm1230_vm6 = vweird.f32 %v1224_v19 }
 0x431   :  { %v1188_v25 = vsub.f32 1.0, %v1187_v29  ;;  %vm1212_vm2 = vmor %vm1210_vm0, %vm1211_vm14  ;;  %v1234_v51 = vand.u32 2147483647, %v1224_v19  ;;  %v1237_v63 = vor.u32 1.1754944e-38, %v1236_v50 }
 0x432   :  { %v1207_v31 = vsub.f32 1.0, %v1206_v24 }
 0x433   :  { %v1189_v30 = vmul.f32 %v1718_v12, %v1188_v25  ;;  %vm1235_vm8 = vcmp.eq.f32.partialorder %v1234_v51, 8.507059e+37 }
 0x434   :  { %v1208_v27 = vmul.f32 %v1720_v32, %v1207_v31 }
 0x435   :  { %v1722_v26 = vpop.eup %1721  ;;  %v1190_v35 = vadd.f32 %v1718_v12, %v1189_v30 }
 0x436   :  { %v1209_v16 = vadd.f32 %v1720_v32, %v1208_v27  ;;  %v1226_v47 = vmul.f32 %v1722_v26, %v1224_v19  ;;  %v1724_v39 = vpop.eup %1723  ;;  %vm1231_vm5 = vweird.f32 %v1722_v26 }
 0x437   :  { %v1194_v38 = vsel %vm1193_vm1, %v1718_v12, %v1190_v35  ;;  %vm1232_vm7 = vmor %vm1230_vm6, %vm1231_vm5 }
 0x438   :  { %v1199_v40 = vsel %vm1196_vm3, %v1198_v11, %v1194_v38  ;;  %v1213_v41 = vsel %vm1212_vm2, %v1720_v32, %v1209_v16  ;;  %v1227_v42 = vsub.f32 1.0, %v1226_v47 }
 0x439   :  { %v1218_v43 = vsel %vm1215_vm4, %v1217_v37, %v1213_v41  ;;  %v1241_v44 = vmul.f32 %v1724_v39, %v1199_v40 }
 0x43a   :  { %v1240_v45 = vmul.f32 %v1218_v43, %v2799_v33  ;;  %v1228_v46 = vmul.f32 %v1722_v26, %v1227_v42 }
 0x43c   :  { %v2871_v48 = vadd.f32 %v1241_v44, %v1240_v45  ;;  %v1229_v49 = vadd.f32 %v1722_v26, %v1228_v46 }
 0x43e   :  { %1725 = vtanh.f32 %v2871_v48  ;;  %v1233_v55 = vsel %vm1232_vm7, %v1722_v26, %v1229_v49 }
 0x43f   :  { %v1238_v6 = vsel %vm1235_vm8, %v1237_v63, %v1233_v55  ;;  %v3186_v55 = vld [vmem:[#allocation59_spill] sm:$0xff] }
 0x444   :  { %v1726_v54 = vpop.eup %1725 }
 0x445   :  { %v1244_v20 = vmul.f32 %v1726_v54, %v1238_v6  ;;  %v3187_v54 = vld [vmem:[#allocation60_spill] sm:$0xff] }
 0x447   :  { %1268 = vmatmul.f32.vlgmr.msrb.gmra.mxu0 %v1244_v20  ;;  %1288 = vmatmul.f32.vlgmr.msrb.gmra.mxu1 %v1244_v20 }
 0x448   :  { %1308 = vmatmul.f32.vlgmr.msrb.gmra.mxu2 %v1244_v20  ;;  %1328 = vmatmul.f32.vlgmr.msrb.gmra.mxu3 %v1244_v20 }
 0x4c4   :  { %v1269_v33 = vpop.f32.mrf.mxu0  ;;  %v1289_v1 = vpop.f32.mrf.mxu1 }
 0x4c5   :  { %v1270_v58 = vadd.f32 %v1269_v33, %v3182_v60  ;;  %v1290_v57 = vadd.f32 %v1289_v1, %v3183_v8  ;;  %v3188_v60 = vld [vmem:[#allocation62_spill] sm:$0xff] }
 0x4c7   :  { %v1620_v52 = vmul.f32 -1.442695, %v1270_v58  ;;  %v1621_v53 = vmul.f32 -1.442695, %v1290_v57 }
 0x4c9   :  { %1727 = vpow2.f32 %v1620_v52 }
 0x4ca   :  { %1729 = vpow2.f32 %v1621_v53 }
 0x4cb   :  { %v1329_v7 = vpop.f32.mrf.mxu3  ;;  %v1309_v3 = vpop.f32.mrf.mxu2 }
 0x4cc   :  { %v1330_v34 = vadd.f32 %v1329_v7, %v3184_v59  ;;  %v1310_v21 = vadd.f32 %v1309_v3, %v3185_v17 }
 0x4ce   :  { %v1622_v61 = vmul.f32 -1.442695, %v1330_v34 }
 0x4cf   :  { %v1728_v56 = vpop.eup %1727 }
 0x4d0   :  { %v1730_v0 = vpop.eup %1729  ;;  %v1335_v5 = vadd.f32 1.0, %v1728_v56  ;;  %1731 = vpow2.f32 %v1622_v61 }
 0x4d1   :  { %v1354_v62 = vadd.f32 1.0, %v1730_v0  ;;  %v3189_v0 = vld [vmem:[#allocation61_spill] sm:$0xff] }
 0x4d2   :  { %1733 = vrcp.f32 %v1335_v5  ;;  %v1347_v23 = vand.u32 2147483648, %v1335_v5  ;;  %v1345_v29 = vand.u32 2147483647, %v1335_v5  ;;  %vm1341_vm11 = vweird.f32 %v1335_v5 }
 0x4d3   :  { %1735 = vrcp.f32 %v1354_v62  ;;  %v1366_v15 = vand.u32 2147483648, %v1354_v62  ;;  %v1364_v25 = vand.u32 2147483647, %v1354_v62  ;;  %vm1360_vm12 = vweird.f32 %v1354_v62 }
 0x4d4   :  { %v1348_v28 = vor.u32 1.1754944e-38, %v1347_v23  ;;  %vm1346_vm15 = vcmp.eq.f32.partialorder %v1345_v29, 8.507059e+37 }
 0x4d5   :  { %v1367_v27 = vor.u32 1.1754944e-38, %v1366_v15  ;;  %vm1365_vm0 = vcmp.eq.f32.partialorder %v1364_v25, 8.507059e+37 }
 0x4d6   :  { %v1732_v2 = vpop.eup %1731 }
 0x4d7   :  { %v1374_v4 = vadd.f32 1.0, %v1732_v2 }
 0x4d8   :  { %v1734_v36 = vpop.eup %1733 }
 0x4d9   :  { %v1736_v9 = vpop.eup %1735  ;;  %v1337_v10 = vmul.f32 %v1734_v36, %v1335_v5  ;;  %1737 = vrcp.f32 %v1374_v4  ;;  %vm1342_vm9 = vweird.f32 %v1734_v36  ;;  %v1386_v42 = vand.u32 2147483648, %v1374_v4 }
 0x4da   :  { %v1356_v14 = vmul.f32 %v1736_v9, %v1354_v62  ;;  %1739 = vtanh.f32 %v1310_v21  ;;  %vm1361_vm10 = vweird.f32 %v1736_v9  ;;  %vm1343_vm13 = vmor %vm1341_vm11, %vm1342_vm9  ;;  %vm1380_vm2 = vweird.f32 %v1374_v4 }
 0x4db   :  { %v1338_v19 = vsub.f32 1.0, %v1337_v10  ;;  %vm1362_vm14 = vmor %vm1360_vm12, %vm1361_vm10  ;;  %v1384_v43 = vand.u32 2147483647, %v1374_v4  ;;  %v1387_v45 = vor.u32 1.1754944e-38, %v1386_v42 }
 0x4dc   :  { %v1357_v12 = vsub.f32 1.0, %v1356_v14 }
 0x4dd   :  { %v1339_v32 = vmul.f32 %v1734_v36, %v1338_v19  ;;  %vm1385_vm4 = vcmp.eq.f32.partialorder %v1384_v43, 8.507059e+37 }
 0x4de   :  { %v1358_v24 = vmul.f32 %v1736_v9, %v1357_v12 }
 0x4df   :  { %v1738_v31 = vpop.eup %1737  ;;  %v1340_v13 = vadd.f32 %v1734_v36, %v1339_v32 }
 0x4e0   :  { %v1359_v30 = vadd.f32 %v1736_v9, %v1358_v24  ;;  %v1376_v18 = vmul.f32 %v1738_v31, %v1374_v4  ;;  %v1740_v26 = vpop.eup %1739  ;;  %vm1381_vm1 = vweird.f32 %v1738_v31 }
 0x4e1   :  { %v1344_v22 = vsel %vm1343_vm13, %v1734_v36, %v1340_v13  ;;  %vm1382_vm3 = vmor %vm1380_vm2, %vm1381_vm1 }
 0x4e2   :  { %v1349_v35 = vsel %vm1346_vm15, %v1348_v28, %v1344_v22  ;;  %v1363_v11 = vsel %vm1362_vm14, %v1736_v9, %v1359_v30  ;;  %v1377_v16 = vsub.f32 1.0, %v1376_v18 }
 0x4e3   :  { %v1368_v47 = vsel %vm1365_vm0, %v1367_v27, %v1363_v11  ;;  %v1391_v37 = vmul.f32 %v1740_v26, %v1349_v35 }
 0x4e4   :  { %v1390_v38 = vmul.f32 %v1368_v47, %v2871_v48  ;;  %v1378_v39 = vmul.f32 %v1738_v31, %v1377_v16 }
 0x4e6   :  { %v2879_v40 = vadd.f32 %v1391_v37, %v1390_v38  ;;  %v1379_v41 = vadd.f32 %v1738_v31, %v1378_v39 }
 0x4e8   :  { %1741 = vtanh.f32 %v2879_v40  ;;  %v1383_v44 = vsel %vm1382_vm3, %v1738_v31, %v1379_v41 }
 0x4e9   :  { %v1388_v49 = vsel %vm1385_vm4, %v1387_v45, %v1383_v44 }
 0x4ee   :  { %v1742_v46 = vpop.eup %1741 }
 0x4ef   :  { %v1394_v50 = vmul.f32 %v1742_v46, %v1388_v49 }
 0x4f1   :  { %1418 = vmatmul.f32.vlgmr.msra.gmra.mxu0 %v1394_v50  ;;  %1438 = vmatmul.f32.vlgmr.msra.gmra.mxu1 %v1394_v50 }
 0x4f2   :  { %1458 = vmatmul.f32.vlgmr.msra.gmra.mxu2 %v1394_v50  ;;  %1478 = vmatmul.f32.vlgmr.msra.gmra.mxu3 %v1394_v50 }
 0x56e   :  { %v1419_v48 = vpop.f32.mrf.mxu0  ;;  %v1439_v51 = vpop.f32.mrf.mxu1 }
 0x56f   :  { %v1420_v63 = vadd.f32 %v1419_v48, %v3186_v55  ;;  %v1440_v6 = vadd.f32 %v1439_v51, %v3187_v54 }
 0x571   :  { %v1623_v20 = vmul.f32 -1.442695, %v1420_v63  ;;  %v1624_v33 = vmul.f32 -1.442695, %v1440_v6 }
 0x573   :  { %1743 = vpow2.f32 %v1623_v20 }
 0x574   :  { %1745 = vpow2.f32 %v1624_v33 }
 0x575   :  { %v1479_v1 = vpop.f32.mrf.mxu3  ;;  %v1459_v59 = vpop.f32.mrf.mxu2 }
 0x576   :  { %v1480_v58 = vadd.f32 %v1479_v1, %v3188_v60  ;;  %v1460_v5 = vadd.f32 %v1459_v59, %v3189_v0 }
 0x578   :  { %v1625_v8 = vmul.f32 -1.442695, %v1480_v58 }
 0x579   :  { %v1744_v57 = vpop.eup %1743 }
 0x57a   :  { %v1746_v52 = vpop.eup %1745  ;;  %v1485_v53 = vadd.f32 1.0, %v1744_v57  ;;  %1747 = vpow2.f32 %v1625_v8 }
 0x57b   :  { %v1504_v7 = vadd.f32 1.0, %v1746_v52 }
 0x57c   :  { %1749 = vrcp.f32 %v1485_v53  ;;  %v1497_v17 = vand.u32 2147483648, %v1485_v53  ;;  %v1495_v10 = vand.u32 2147483647, %v1485_v53  ;;  %vm1491_vm7 = vweird.f32 %v1485_v53 }
 0x57d   :  { %1751 = vrcp.f32 %v1504_v7  ;;  %v1516_v21 = vand.u32 2147483648, %v1504_v7  ;;  %v1514_v19 = vand.u32 2147483647, %v1504_v7  ;;  %vm1510_vm8 = vweird.f32 %v1504_v7 }
 0x57e   :  { %v1498_v15 = vor.u32 1.1754944e-38, %v1497_v17  ;;  %vm1496_vm11 = vcmp.eq.f32.partialorder %v1495_v10, 8.507059e+37 }
 0x57f   :  { %v1517_v24 = vor.u32 1.1754944e-38, %v1516_v21  ;;  %vm1515_vm12 = vcmp.eq.f32.partialorder %v1514_v19, 8.507059e+37 }
 0x580   :  { %v1748_v34 = vpop.eup %1747 }
 0x581   :  { %v1524_v61 = vadd.f32 1.0, %v1748_v34 }
 0x582   :  { %v1750_v56 = vpop.eup %1749 }
 0x583   :  { %v1752_v62 = vpop.eup %1751  ;;  %v1487_v3 = vmul.f32 %v1750_v56, %v1485_v53  ;;  %1753 = vrcp.f32 %v1524_v61  ;;  %vm1492_vm5 = vweird.f32 %v1750_v56  ;;  %v1536_v16 = vand.u32 2147483648, %v1524_v61 }
 0x584   :  { %v1506_v2 = vmul.f32 %v1752_v62, %v1504_v7  ;;  %1755 = vtanh.f32 %v1460_v5  ;;  %vm1511_vm6 = vweird.f32 %v1752_v62  ;;  %vm1493_vm9 = vmor %vm1491_vm7, %vm1492_vm5  ;;  %vm1530_vm14 = vweird.f32 %v1524_v61 }
 0x585   :  { %v1488_v4 = vsub.f32 1.0, %v1487_v3  ;;  %vm1512_vm10 = vmor %vm1510_vm8, %vm1511_vm6  ;;  %v1534_v47 = vand.u32 2147483647, %v1524_v61  ;;  %v1537_v38 = vor.u32 1.1754944e-38, %v1536_v16 }
 0x586   :  { %v1507_v36 = vsub.f32 1.0, %v1506_v2 }
 0x587   :  { %v1489_v9 = vmul.f32 %v1750_v56, %v1488_v4  ;;  %vm1535_vm0 = vcmp.eq.f32.partialorder %v1534_v47, 8.507059e+37 }
 0x588   :  { %v1508_v14 = vmul.f32 %v1752_v62, %v1507_v36 }
 0x589   :  { %v1754_v12 = vpop.eup %1753  ;;  %v1490_v23 = vadd.f32 %v1750_v56, %v1489_v9 }
 0x58a   :  { %v1509_v32 = vadd.f32 %v1752_v62, %v1508_v14  ;;  %v1526_v29 = vmul.f32 %v1754_v12, %v1524_v61  ;;  %v1756_v31 = vpop.eup %1755  ;;  %vm1531_vm13 = vweird.f32 %v1754_v12 }
 0x58b   :  { %v1494_v25 = vsel %vm1493_vm9, %v1750_v56, %v1490_v23  ;;  %vm1532_vm15 = vmor %vm1530_vm14, %vm1531_vm13 }
 0x58c   :  { %v1499_v13 = vsel %vm1496_vm11, %v1498_v15, %v1494_v25  ;;  %v1513_v28 = vsel %vm1512_vm10, %v1752_v62, %v1509_v32  ;;  %v1527_v30 = vsub.f32 1.0, %v1526_v29 }
 0x58d   :  { %v1518_v18 = vsel %vm1515_vm12, %v1517_v24, %v1513_v28  ;;  %v1541_v27 = vmul.f32 %v1756_v31, %v1499_v13 }
 0x58e   :  { %v1540_v22 = vmul.f32 %v1518_v18, %v2879_v40  ;;  %v1528_v26 = vmul.f32 %v1754_v12, %v1527_v30 }
 0x590   :  { %v1542_v35 = vadd.f32 %v1541_v27, %v1540_v22  ;;  %v1529_v11 = vadd.f32 %v1754_v12, %v1528_v26 }
 0x592   :  { %1757 = vtanh.f32 %v1542_v35  ;;  %v1533_v37 = vsel %vm1532_vm15, %v1754_v12, %v1529_v11 }
 0x593   :  { %v1538_v40 = vsel %vm1535_vm0, %v1537_v38, %v1533_v37 }
 0x598   :  { %v1758_v39 = vpop.eup %1757 }
 0x599   :  { %v1544_v41 = vmul.f32 %v1758_v39, %v1538_v40 }
 0x59b   :  { %1545 = vst [vmem:[#allocation6] sm:$0xff] %v1544_v41 }
 0x59c   :  { %1556 = dma.vmem_to_hbm [thread:$0]  %s1552_s27, 128, %s1554_s29, [#allocation5]  }
 0x59d   :  { %1873 = dma.done.wait [#allocation5], 128  }
 0x59e   :  { %1874 = vsyncadd [#allocation5], 4294967168 }
 0x59f   :  { %1561 = vsyncpa [#allocation4], 1 }
 0x5a0   :  { %1562 = vsyncpa [#allocation5], 1 }

</bundles_post_ra>
